<compile_context>
chip_gen: v6e
topology: v6e:2x2x1
jax: 0.10.0
libtpu: 0.0.40
codegen_flags: <defaults>
</compile_context>

<pallas_src>
import functools
import math

import jax
import jax.numpy as jnp
from jax.experimental import pallas as pl
from jax.experimental.pallas import tpu as pltpu


# --------------------------------------------------------------------------
# Kernel 1: y_out = LayerNorm(MaskedSelfAttention(y) + y)
# --------------------------------------------------------------------------
def _self_attn_ln_kernel(y_ref, wqkv_ref, bqkv_ref, wo_ref, bo_ref,
                         g_ref, b_ref, o_ref, *, n_heads, scale, eps):
    y = y_ref[0]                                            # (Ty, D) f32
    Ty, D = y.shape
    Dh = D // n_heads

    # one fused QKV matmul (D -> 3D), bf16 operands, f32 accumulation
    qkv = jnp.dot(y.astype(jnp.bfloat16), wqkv_ref[...],
                  preferred_element_type=jnp.float32) + bqkv_ref[...]

    # fold the softmax scale into Q once (single Ty*D VPU multiply),
    # not into every (Ty,Ty) score tile per head
    q = (qkv[:, :D] * scale).astype(jnp.bfloat16)
    k = qkv[:, D:2 * D].astype(jnp.bfloat16)
    v = qkv[:, 2 * D:].astype(jnp.bfloat16)

    # causal mask, computed once and shared by all heads
    qi = jax.lax.broadcasted_iota(jnp.int32, (Ty, Ty), 0)
    ki = jax.lax.broadcasted_iota(jnp.int32, (Ty, Ty), 1)
    causal_ok = ki <= qi

    # contract last dims directly -> no materialized kh.T (no XLU transpose)
    dnums = (((1,), (1,)), ((), ()))

    # per-head softmax loop (H small and static; switch to lax.fori_loop for
    # large H to bound vreg live ranges)
    heads = []
    for h in range(n_heads):
        sl = slice(h * Dh, (h + 1) * Dh)
        qh, kh, vh = q[:, sl], k[:, sl], v[:, sl]

        s = jax.lax.dot_general(qh, kh, dnums,
                                preferred_element_type=jnp.float32)
        s = jnp.where(causal_ok, s, jnp.float32(-1e30))
        m = jnp.max(s, axis=-1, keepdims=True)
        p = jnp.exp(s - m)
        denom = jnp.sum(p, axis=-1, keepdims=True)
        oh = jnp.dot(p.astype(jnp.bfloat16), vh,
                     preferred_element_type=jnp.float32)
        heads.append(oh * pl.reciprocal(denom, approx=True))   # EUP recip

    # single full-width output projection: concat_h(o_h) @ Wo  (K = D, not Dh)
    o_cat = jnp.concatenate(heads, axis=-1).astype(jnp.bfloat16)
    attn = jnp.dot(o_cat, wo_ref[...],
                   preferred_element_type=jnp.float32) + bo_ref[...]

    res = attn + y                                          # attn(y) + y

    # fused LayerNorm (f32)
    mean = jnp.mean(res, axis=-1, keepdims=True)
    xc = res - mean
    var = jnp.mean(xc * xc, axis=-1, keepdims=True)
    normed = xc * jax.lax.rsqrt(var + eps) * g_ref[...] + b_ref[...]
    o_ref[0] = normed.astype(o_ref.dtype)


def self_attn_ln_block(y, wqkv, bqkv, wo, bo, ln_g, ln_b, n_heads, eps=1e-5):
    B, Ty, D = y.shape
    scale = 1.0 / math.sqrt(D // n_heads)
    return pl.pallas_call(
        functools.partial(_self_attn_ln_kernel,
                          n_heads=n_heads, scale=scale, eps=eps),
        out_shape=jax.ShapeDtypeStruct((B, Ty, D), y.dtype),
        grid=(B,),
        in_specs=[
            pl.BlockSpec((1, Ty, D), lambda b: (b, 0, 0)),
            pl.BlockSpec((D, 3 * D), lambda b: (0, 0)),
            pl.BlockSpec((1, 3 * D), lambda b: (0, 0)),
            pl.BlockSpec((D, D), lambda b: (0, 0)),
            pl.BlockSpec((1, D), lambda b: (0, 0)),
            pl.BlockSpec((1, D), lambda b: (0, 0)),
            pl.BlockSpec((1, D), lambda b: (0, 0)),
        ],
        out_specs=pl.BlockSpec((1, Ty, D), lambda b: (b, 0, 0)),
        compiler_params=pltpu.CompilerParams(
            dimension_semantics=("parallel",)),      # 2 TCs on v7x
    )(y, wqkv, bqkv, wo, bo, ln_g, ln_b)


# --------------------------------------------------------------------------
# Kernel 2: y_out = ProcessingLayer( EncoderDecoderAttention(y, x) + y )
#           (cross-attn + residual + LN + fc1 + GELU + fc2 + residual, fused)
# --------------------------------------------------------------------------
def _cross_attn_mlp_kernel(y_ref, x_ref, wq_ref, bq_ref, wkv_ref, bkv_ref,
                           wo_ref, bo_ref, g_ref, b_ref, w1_ref, b1_ref,
                           w2_ref, b2_ref, o_ref, *, n_heads, scale, eps):
    y = y_ref[0]                                            # (Ty, D) f32
    x = x_ref[0]                                            # (Tx, D) f32
    Ty, D = y.shape
    Dh = D // n_heads

    q = jnp.dot(y.astype(jnp.bfloat16), wq_ref[...],
                preferred_element_type=jnp.float32) + bq_ref[...]
    kv = jnp.dot(x.astype(jnp.bfloat16), wkv_ref[...],
                 preferred_element_type=jnp.float32) + bkv_ref[...]

    q = (q * scale).astype(jnp.bfloat16)                    # fold scale once
    k = kv[:, :D].astype(jnp.bfloat16)
    v = kv[:, D:].astype(jnp.bfloat16)

    dnums = (((1,), (1,)), ((), ()))                        # q . k^T, no transpose

    heads = []
    for h in range(n_heads):
        sl = slice(h * Dh, (h + 1) * Dh)
        qh, kh, vh = q[:, sl], k[:, sl], v[:, sl]

        s = jax.lax.dot_general(qh, kh, dnums,
                                preferred_element_type=jnp.float32)
        m = jnp.max(s, axis=-1, keepdims=True)
        p = jnp.exp(s - m)
        denom = jnp.sum(p, axis=-1, keepdims=True)
        oh = jnp.dot(p.astype(jnp.bfloat16), vh,
                     preferred_element_type=jnp.float32)
        heads.append(oh * pl.reciprocal(denom, approx=True))

    o_cat = jnp.concatenate(heads, axis=-1).astype(jnp.bfloat16)
    attn = jnp.dot(o_cat, wo_ref[...],
                   preferred_element_type=jnp.float32) + bo_ref[...]

    y1 = attn + y                                           # cross-attn + residual

    # ProcessingLayer: pre-LN GELU MLP (D -> 4D -> D) with residual
    mean = jnp.mean(y1, axis=-1, keepdims=True)
    xc = y1 - mean
    var = jnp.mean(xc * xc, axis=-1, keepdims=True)
    h = xc * jax.lax.rsqrt(var + eps) * g_ref[...] + b_ref[...]

    h = jnp.dot(h.astype(jnp.bfloat16), w1_ref[...],
                preferred_element_type=jnp.float32) + b1_ref[...]
    # TODO(synk): PyTorch nn.GELU default is exact erf GELU; tanh approximation
    # is used for a clean EUP lowering (ProcessingLayer internals assumed).
    h = jax.nn.gelu(h, approximate=True)
    h = jnp.dot(h.astype(jnp.bfloat16), w2_ref[...],
                preferred_element_type=jnp.float32) + b2_ref[...]

    o_ref[0] = (h + y1).astype(o_ref.dtype)


def cross_attn_mlp_block(y, x, wq, bq, wkv, bkv, wo, bo,
                         ln_g, ln_b, w1, b1, w2, b2, n_heads, eps=1e-5):
    B, Ty, D = y.shape
    Tx = x.shape[1]
    Dff = w1.shape[1]
    scale = 1.0 / math.sqrt(D // n_heads)
    return pl.pallas_call(
        functools.partial(_cross_attn_mlp_kernel,
                          n_heads=n_heads, scale=scale, eps=eps),
        out_shape=jax.ShapeDtypeStruct((B, Ty, D), y.dtype),
        grid=(B,),
        in_specs=[
            pl.BlockSpec((1, Ty, D), lambda b: (b, 0, 0)),
            pl.BlockSpec((1, Tx, D), lambda b: (b, 0, 0)),
            pl.BlockSpec((D, D), lambda b: (0, 0)),
            pl.BlockSpec((1, D), lambda b: (0, 0)),
            pl.BlockSpec((D, 2 * D), lambda b: (0, 0)),
            pl.BlockSpec((1, 2 * D), lambda b: (0, 0)),
            pl.BlockSpec((D, D), lambda b: (0, 0)),
            pl.BlockSpec((1, D), lambda b: (0, 0)),
            pl.BlockSpec((1, D), lambda b: (0, 0)),
            pl.BlockSpec((1, D), lambda b: (0, 0)),
            pl.BlockSpec((D, Dff), lambda b: (0, 0)),
            pl.BlockSpec((1, Dff), lambda b: (0, 0)),
            pl.BlockSpec((Dff, D), lambda b: (0, 0)),
            pl.BlockSpec((1, D), lambda b: (0, 0)),
        ],
        out_specs=pl.BlockSpec((1, Ty, D), lambda b: (b, 0, 0)),
        compiler_params=pltpu.CompilerParams(
            dimension_semantics=("parallel",)),
    )(y, x, wq, bq, wkv, bkv, wo, bo, ln_g, ln_b, w1, b1, w2, b2)


# --------------------------------------------------------------------------
# Decoder forward (2 pallas_calls total)
# --------------------------------------------------------------------------
def decoder_forward(x, y, params, n_heads):
    """x: encoder output [B, Tx, D]; y: decoder input [B, Ty, D]."""
    sa = params["self_attn"]
    # y = layernorm(masked_attention(y) + y)                      -- kernel 1
    y = self_attn_ln_block(y, sa["wqkv"], sa["bqkv"], sa["wo"], sa["bo"],
                           params["ln_g"], params["ln_b"], n_heads)

    ca = params["cross_attn"]
    pr = params["proc"]
    # y = decoder_processing_layer(encoder_decoder_attn(y, x) + y) -- kernel 2
    # TODO(synk): nc.ProcessingLayer internals not provided; assumed pre-LN
    # GELU MLP (D -> 4D -> D) with residual connection.
    y = cross_attn_mlp_block(y, x, ca["wq"], ca["bq"], ca["wkv"], ca["bkv"],
                             ca["wo"], ca["bo"], pr["ln_g"], pr["ln_b"],
                             pr["w_fc1"], pr["b_fc1"], pr["w_fc2"], pr["b_fc2"],
                             n_heads)
    return y


# --------------------------------------------------------------------------
# Parameter init (QKV / KV weights pre-fused; matmul weights stored bf16,
# biases and LayerNorm params f32)
# --------------------------------------------------------------------------
def init_params(key, D):
    ks = jax.random.split(key, 7)
    std = 0.02

    def dense(k, din, dout):
        # bf16 weights: 2x MXU throughput on v5e/v6e/v7x, half the DMA bytes
        return (jax.random.normal(k, (din, dout), jnp.float32) * std).astype(
            jnp.bfloat16)

    return {
        "self_attn": {
            "wqkv": dense(ks[0], D, 3 * D),
            "bqkv": jnp.zeros((1, 3 * D), jnp.float32),
            "wo": dense(ks[1], D, D),
            "bo": jnp.zeros((1, D), jnp.float32),
        },
        "ln_g": jnp.ones((1, D), jnp.float32),
        "ln_b": jnp.zeros((1, D), jnp.float32),
        "cross_attn": {
            "wq": dense(ks[2], D, D),
            "bq": jnp.zeros((1, D), jnp.float32),
            "wkv": dense(ks[3], D, 2 * D),
            "bkv": jnp.zeros((1, 2 * D), jnp.float32),
            "wo": dense(ks[4], D, D),
            "bo": jnp.zeros((1, D), jnp.float32),
        },
        "proc": {
            "ln_g": jnp.ones((1, D), jnp.float32),
            "ln_b": jnp.zeros((1, D), jnp.float32),
            "w_fc1": dense(ks[5], D, 4 * D),
            "b_fc1": jnp.zeros((1, 4 * D), jnp.float32),
            "w_fc2": dense(ks[6], 4 * D, D),
            "b_fc2": jnp.zeros((1, D), jnp.float32),
        },
    }


# --------------------------------------------------------------------------
if __name__ == "__main__":
    B, Tx, Ty, D, H = 2, 8, 8, 32, 4   # batch, enc seq, dec seq, dim_embedding, n_heads

    root = jax.random.PRNGKey(0)
    k_param, k_x, k_y = jax.random.split(root, 3)
    params = init_params(k_param, D)

    x = jax.random.normal(k_x, (B, Tx, D), jnp.float32)   # encoder output
    y = jax.random.normal(k_y, (B, Ty, D), jnp.float32)   # decoder input

    out = jax.jit(functools.partial(decoder_forward, n_heads=H))(x, y, params)
    out = jax.block_until_ready(out)
    assert out.shape == (B, Ty, D) and out.dtype == jnp.float32
    assert bool(jnp.all(jnp.isfinite(out)))
    print("KERNEL_OK")
</pallas_src>

<mosaic_0001>
module attributes {stable_mosaic.version = 11 : i64} {
  func.func @_self_attn_ln_kernel(%arg0: i32, %arg1: memref<1x8x32xf32, #tpu.memory_space<vmem>>, %arg2: memref<32x96xbf16, #tpu.memory_space<vmem>>, %arg3: memref<1x96xf32, #tpu.memory_space<vmem>>, %arg4: memref<32x32xbf16, #tpu.memory_space<vmem>>, %arg5: memref<1x32xf32, #tpu.memory_space<vmem>>, %arg6: memref<1x32xf32, #tpu.memory_space<vmem>>, %arg7: memref<1x32xf32, #tpu.memory_space<vmem>>, %arg8: memref<1x8x32xf32, #tpu.memory_space<vmem>>) attributes {dimension_semantics = [#tpu.dimension_semantics<parallel>], iteration_bounds = array<i64: 2>, scalar_prefetch = 0 : i64, scratch_operands = 0 : i64, tpu.core_type = #tpu.core_type<tc>, window_params = [{transform_indices = @transform_0, window_bounds = array<i64: 1, 8, 32>}, {pipeline_mode = #tpu.pipeline_mode<synchronous>, transform_indices = @transform_1, window_bounds = array<i64: 32, 96>}, {pipeline_mode = #tpu.pipeline_mode<synchronous>, transform_indices = @transform_2, window_bounds = array<i64: 1, 96>}, {pipeline_mode = #tpu.pipeline_mode<synchronous>, transform_indices = @transform_3, window_bounds = array<i64: 32, 32>}, {pipeline_mode = #tpu.pipeline_mode<synchronous>, transform_indices = @transform_4, window_bounds = array<i64: 1, 32>}, {pipeline_mode = #tpu.pipeline_mode<synchronous>, transform_indices = @transform_5, window_bounds = array<i64: 1, 32>}, {pipeline_mode = #tpu.pipeline_mode<synchronous>, transform_indices = @transform_6, window_bounds = array<i64: 1, 32>}, {transform_indices = @transform_7, window_bounds = array<i64: 1, 8, 32>}]} {
    %c0 = arith.constant 0 : index
    %c0_0 = arith.constant 0 : index
    %c0_1 = arith.constant 0 : index
    %0 = vector.load %arg1[%c0, %c0_0, %c0_1] : memref<1x8x32xf32, #tpu.memory_space<vmem>>, vector<1x8x32xf32>
    %1 = vector.shape_cast %0 : vector<1x8x32xf32> to vector<8x32xf32>
    %2 = arith.truncf %1 : vector<8x32xf32> to vector<8x32xbf16>
    %c0_2 = arith.constant 0 : index
    %c0_3 = arith.constant 0 : index
    %3 = vector.load %arg2[%c0_2, %c0_3] : memref<32x96xbf16, #tpu.memory_space<vmem>>, vector<32x96xbf16>
    %cst = arith.constant dense<0.000000e+00> : vector<8x96xf32>
    %4 = tpu.matmul %2, %3, %cst {dimension_numbers = #tpu.dot_dimension_numbers<[1], [0], [0], [1], [0, 0, 1, 1], [], []>} : vector<8x32xbf16>, vector<32x96xbf16>, vector<8x96xf32> -> vector<8x96xf32>
    %c0_4 = arith.constant 0 : index
    %c0_5 = arith.constant 0 : index
    %5 = vector.load %arg3[%c0_4, %c0_5] : memref<1x96xf32, #tpu.memory_space<vmem>>, vector<1x96xf32>
    %6 = vector.broadcast %5 : vector<1x96xf32> to vector<8x96xf32>
    %7 = arith.addf %4, %6 : vector<8x96xf32>
    %8 = vector.extract_strided_slice %7 {offsets = [0, 0], sizes = [8, 32], strides = [1, 1]} : vector<8x96xf32> to vector<8x32xf32>
    %cst_6 = arith.constant 0.353553385 : f32
    %9 = vector.broadcast %cst_6 : f32 to vector<8x32xf32>
    %10 = arith.mulf %8, %9 : vector<8x32xf32>
    %11 = arith.truncf %10 : vector<8x32xf32> to vector<8x32xbf16>
    %12 = vector.extract_strided_slice %7 {offsets = [0, 32], sizes = [8, 32], strides = [1, 1]} : vector<8x96xf32> to vector<8x32xf32>
    %13 = arith.truncf %12 : vector<8x32xf32> to vector<8x32xbf16>
    %14 = vector.extract_strided_slice %7 {offsets = [0, 64], sizes = [8, 32], strides = [1, 1]} : vector<8x96xf32> to vector<8x32xf32>
    %15 = arith.truncf %14 : vector<8x32xf32> to vector<8x32xbf16>
    %16 = tpu.iota {dimensions = array<i32: 0>} : vector<8x8xi32>
    %17 = tpu.iota {dimensions = array<i32: 1>} : vector<8x8xi32>
    %18 = arith.cmpi sle, %17, %16 : vector<8x8xi32>
    %19 = vector.extract_strided_slice %11 {offsets = [0, 0], sizes = [8, 8], strides = [1, 1]} : vector<8x32xbf16> to vector<8x8xbf16>
    %20 = vector.extract_strided_slice %13 {offsets = [0, 0], sizes = [8, 8], strides = [1, 1]} : vector<8x32xbf16> to vector<8x8xbf16>
    %21 = vector.extract_strided_slice %15 {offsets = [0, 0], sizes = [8, 8], strides = [1, 1]} : vector<8x32xbf16> to vector<8x8xbf16>
    %cst_7 = arith.constant dense<0.000000e+00> : vector<8x8xf32>
    %22 = tpu.matmul %19, %20, %cst_7 {dimension_numbers = #tpu.dot_dimension_numbers<[1], [1], [0], [0], [0, 0, 1, 0], [], []>} : vector<8x8xbf16>, vector<8x8xbf16>, vector<8x8xf32> -> vector<8x8xf32>
    %cst_8 = arith.constant -1.000000e+30 : f32
    %23 = vector.broadcast %cst_8 : f32 to vector<8x8xf32>
    %24 = arith.select %18, %22, %23 : vector<8x8xi1>, vector<8x8xf32>
    %cst_9 = arith.constant dense<0xFF800000> : vector<8xf32>
    %25 = vector.multi_reduction <maximumf>, %24, %cst_9 [1] : vector<8x8xf32> to vector<8xf32>
    %26 = vector.shape_cast %25 : vector<8xf32> to vector<8x1xf32>
    %27 = vector.broadcast %26 : vector<8x1xf32> to vector<8x8xf32>
    %28 = arith.subf %24, %27 : vector<8x8xf32>
    %29 = math.exp %28 : vector<8x8xf32>
    %cst_10 = arith.constant dense<0.000000e+00> : vector<8xf32>
    %30 = vector.multi_reduction <add>, %29, %cst_10 [1] : vector<8x8xf32> to vector<8xf32>
    %31 = vector.shape_cast %30 : vector<8xf32> to vector<8x1xf32>
    %32 = arith.truncf %29 : vector<8x8xf32> to vector<8x8xbf16>
    %cst_11 = arith.constant dense<0.000000e+00> : vector<8x8xf32>
    %33 = tpu.matmul %32, %21, %cst_11 {dimension_numbers = #tpu.dot_dimension_numbers<[1], [0], [0], [1], [0, 0, 1, 1], [], []>} : vector<8x8xbf16>, vector<8x8xbf16>, vector<8x8xf32> -> vector<8x8xf32>
    %34 = tpu.reciprocal %31 {approx = true} : vector<8x1xf32> -> vector<8x1xf32>
    %35 = vector.broadcast %34 : vector<8x1xf32> to vector<8x8xf32>
    %36 = arith.mulf %33, %35 : vector<8x8xf32>
    %37 = vector.extract_strided_slice %11 {offsets = [0, 8], sizes = [8, 8], strides = [1, 1]} : vector<8x32xbf16> to vector<8x8xbf16>
    %38 = vector.extract_strided_slice %13 {offsets = [0, 8], sizes = [8, 8], strides = [1, 1]} : vector<8x32xbf16> to vector<8x8xbf16>
    %39 = vector.extract_strided_slice %15 {offsets = [0, 8], sizes = [8, 8], strides = [1, 1]} : vector<8x32xbf16> to vector<8x8xbf16>
    %cst_12 = arith.constant dense<0.000000e+00> : vector<8x8xf32>
    %40 = tpu.matmul %37, %38, %cst_12 {dimension_numbers = #tpu.dot_dimension_numbers<[1], [1], [0], [0], [0, 0, 1, 0], [], []>} : vector<8x8xbf16>, vector<8x8xbf16>, vector<8x8xf32> -> vector<8x8xf32>
    %cst_13 = arith.constant -1.000000e+30 : f32
    %41 = vector.broadcast %cst_13 : f32 to vector<8x8xf32>
    %42 = arith.select %18, %40, %41 : vector<8x8xi1>, vector<8x8xf32>
    %cst_14 = arith.constant dense<0xFF800000> : vector<8xf32>
    %43 = vector.multi_reduction <maximumf>, %42, %cst_14 [1] : vector<8x8xf32> to vector<8xf32>
    %44 = vector.shape_cast %43 : vector<8xf32> to vector<8x1xf32>
    %45 = vector.broadcast %44 : vector<8x1xf32> to vector<8x8xf32>
    %46 = arith.subf %42, %45 : vector<8x8xf32>
    %47 = math.exp %46 : vector<8x8xf32>
    %cst_15 = arith.constant dense<0.000000e+00> : vector<8xf32>
    %48 = vector.multi_reduction <add>, %47, %cst_15 [1] : vector<8x8xf32> to vector<8xf32>
    %49 = vector.shape_cast %48 : vector<8xf32> to vector<8x1xf32>
    %50 = arith.truncf %47 : vector<8x8xf32> to vector<8x8xbf16>
    %cst_16 = arith.constant dense<0.000000e+00> : vector<8x8xf32>
    %51 = tpu.matmul %50, %39, %cst_16 {dimension_numbers = #tpu.dot_dimension_numbers<[1], [0], [0], [1], [0, 0, 1, 1], [], []>} : vector<8x8xbf16>, vector<8x8xbf16>, vector<8x8xf32> -> vector<8x8xf32>
    %52 = tpu.reciprocal %49 {approx = true} : vector<8x1xf32> -> vector<8x1xf32>
    %53 = vector.broadcast %52 : vector<8x1xf32> to vector<8x8xf32>
    %54 = arith.mulf %51, %53 : vector<8x8xf32>
    %55 = vector.extract_strided_slice %11 {offsets = [0, 16], sizes = [8, 8], strides = [1, 1]} : vector<8x32xbf16> to vector<8x8xbf16>
    %56 = vector.extract_strided_slice %13 {offsets = [0, 16], sizes = [8, 8], strides = [1, 1]} : vector<8x32xbf16> to vector<8x8xbf16>
    %57 = vector.extract_strided_slice %15 {offsets = [0, 16], sizes = [8, 8], strides = [1, 1]} : vector<8x32xbf16> to vector<8x8xbf16>
    %cst_17 = arith.constant dense<0.000000e+00> : vector<8x8xf32>
    %58 = tpu.matmul %55, %56, %cst_17 {dimension_numbers = #tpu.dot_dimension_numbers<[1], [1], [0], [0], [0, 0, 1, 0], [], []>} : vector<8x8xbf16>, vector<8x8xbf16>, vector<8x8xf32> -> vector<8x8xf32>
    %cst_18 = arith.constant -1.000000e+30 : f32
    %59 = vector.broadcast %cst_18 : f32 to vector<8x8xf32>
    %60 = arith.select %18, %58, %59 : vector<8x8xi1>, vector<8x8xf32>
    %cst_19 = arith.constant dense<0xFF800000> : vector<8xf32>
    %61 = vector.multi_reduction <maximumf>, %60, %cst_19 [1] : vector<8x8xf32> to vector<8xf32>
    %62 = vector.shape_cast %61 : vector<8xf32> to vector<8x1xf32>
    %63 = vector.broadcast %62 : vector<8x1xf32> to vector<8x8xf32>
    %64 = arith.subf %60, %63 : vector<8x8xf32>
    %65 = math.exp %64 : vector<8x8xf32>
    %cst_20 = arith.constant dense<0.000000e+00> : vector<8xf32>
    %66 = vector.multi_reduction <add>, %65, %cst_20 [1] : vector<8x8xf32> to vector<8xf32>
    %67 = vector.shape_cast %66 : vector<8xf32> to vector<8x1xf32>
    %68 = arith.truncf %65 : vector<8x8xf32> to vector<8x8xbf16>
    %cst_21 = arith.constant dense<0.000000e+00> : vector<8x8xf32>
    %69 = tpu.matmul %68, %57, %cst_21 {dimension_numbers = #tpu.dot_dimension_numbers<[1], [0], [0], [1], [0, 0, 1, 1], [], []>} : vector<8x8xbf16>, vector<8x8xbf16>, vector<8x8xf32> -> vector<8x8xf32>
    %70 = tpu.reciprocal %67 {approx = true} : vector<8x1xf32> -> vector<8x1xf32>
    %71 = vector.broadcast %70 : vector<8x1xf32> to vector<8x8xf32>
    %72 = arith.mulf %69, %71 : vector<8x8xf32>
    %73 = vector.extract_strided_slice %11 {offsets = [0, 24], sizes = [8, 8], strides = [1, 1]} : vector<8x32xbf16> to vector<8x8xbf16>
    %74 = vector.extract_strided_slice %13 {offsets = [0, 24], sizes = [8, 8], strides = [1, 1]} : vector<8x32xbf16> to vector<8x8xbf16>
    %75 = vector.extract_strided_slice %15 {offsets = [0, 24], sizes = [8, 8], strides = [1, 1]} : vector<8x32xbf16> to vector<8x8xbf16>
    %cst_22 = arith.constant dense<0.000000e+00> : vector<8x8xf32>
    %76 = tpu.matmul %73, %74, %cst_22 {dimension_numbers = #tpu.dot_dimension_numbers<[1], [1], [0], [0], [0, 0, 1, 0], [], []>} : vector<8x8xbf16>, vector<8x8xbf16>, vector<8x8xf32> -> vector<8x8xf32>
    %cst_23 = arith.constant -1.000000e+30 : f32
    %77 = vector.broadcast %cst_23 : f32 to vector<8x8xf32>
    %78 = arith.select %18, %76, %77 : vector<8x8xi1>, vector<8x8xf32>
    %cst_24 = arith.constant dense<0xFF800000> : vector<8xf32>
    %79 = vector.multi_reduction <maximumf>, %78, %cst_24 [1] : vector<8x8xf32> to vector<8xf32>
    %80 = vector.shape_cast %79 : vector<8xf32> to vector<8x1xf32>
    %81 = vector.broadcast %80 : vector<8x1xf32> to vector<8x8xf32>
    %82 = arith.subf %78, %81 : vector<8x8xf32>
    %83 = math.exp %82 : vector<8x8xf32>
    %cst_25 = arith.constant dense<0.000000e+00> : vector<8xf32>
    %84 = vector.multi_reduction <add>, %83, %cst_25 [1] : vector<8x8xf32> to vector<8xf32>
    %85 = vector.shape_cast %84 : vector<8xf32> to vector<8x1xf32>
    %86 = arith.truncf %83 : vector<8x8xf32> to vector<8x8xbf16>
    %cst_26 = arith.constant dense<0.000000e+00> : vector<8x8xf32>
    %87 = tpu.matmul %86, %75, %cst_26 {dimension_numbers = #tpu.dot_dimension_numbers<[1], [0], [0], [1], [0, 0, 1, 1], [], []>} : vector<8x8xbf16>, vector<8x8xbf16>, vector<8x8xf32> -> vector<8x8xf32>
    %88 = tpu.reciprocal %85 {approx = true} : vector<8x1xf32> -> vector<8x1xf32>
    %89 = vector.broadcast %88 : vector<8x1xf32> to vector<8x8xf32>
    %90 = arith.mulf %87, %89 : vector<8x8xf32>
    %91 = tpu.concatenate %36, %54, %72, %90 in 1 : vector<8x8xf32>, vector<8x8xf32>, vector<8x8xf32>, vector<8x8xf32> -> vector<8x32xf32>
    %92 = arith.truncf %91 : vector<8x32xf32> to vector<8x32xbf16>
    %c0_27 = arith.constant 0 : index
    %c0_28 = arith.constant 0 : index
    %93 = vector.load %arg4[%c0_27, %c0_28] : memref<32x32xbf16, #tpu.memory_space<vmem>>, vector<32x32xbf16>
    %cst_29 = arith.constant dense<0.000000e+00> : vector<8x32xf32>
    %94 = tpu.matmul %92, %93, %cst_29 {dimension_numbers = #tpu.dot_dimension_numbers<[1], [0], [0], [1], [0, 0, 1, 1], [], []>} : vector<8x32xbf16>, vector<32x32xbf16>, vector<8x32xf32> -> vector<8x32xf32>
    %c0_30 = arith.constant 0 : index
    %c0_31 = arith.constant 0 : index
    %95 = vector.load %arg5[%c0_30, %c0_31] : memref<1x32xf32, #tpu.memory_space<vmem>>, vector<1x32xf32>
    %96 = vector.broadcast %95 : vector<1x32xf32> to vector<8x32xf32>
    %97 = arith.addf %94, %96 : vector<8x32xf32>
    %98 = arith.addf %97, %1 : vector<8x32xf32>
    %cst_32 = arith.constant dense<0.000000e+00> : vector<8xf32>
    %99 = vector.multi_reduction <add>, %98, %cst_32 [1] : vector<8x32xf32> to vector<8xf32>
    %100 = vector.shape_cast %99 : vector<8xf32> to vector<8x1xf32>
    %cst_33 = arith.constant 3.200000e+01 : f32
    %101 = vector.broadcast %cst_33 : f32 to vector<8x1xf32>
    %102 = arith.divf %100, %101 : vector<8x1xf32>
    %103 = vector.broadcast %102 : vector<8x1xf32> to vector<8x32xf32>
    %104 = arith.subf %98, %103 : vector<8x32xf32>
    %105 = arith.mulf %104, %104 : vector<8x32xf32>
    %cst_34 = arith.constant dense<0.000000e+00> : vector<8xf32>
    %106 = vector.multi_reduction <add>, %105, %cst_34 [1] : vector<8x32xf32> to vector<8xf32>
    %107 = vector.shape_cast %106 : vector<8xf32> to vector<8x1xf32>
    %cst_35 = arith.constant 3.200000e+01 : f32
    %108 = vector.broadcast %cst_35 : f32 to vector<8x1xf32>
    %109 = arith.divf %107, %108 : vector<8x1xf32>
    %cst_36 = arith.constant 9.99999974E-6 : f32
    %110 = vector.broadcast %cst_36 : f32 to vector<8x1xf32>
    %111 = arith.addf %109, %110 : vector<8x1xf32>
    %112 = math.rsqrt %111 : vector<8x1xf32>
    %113 = vector.broadcast %112 : vector<8x1xf32> to vector<8x32xf32>
    %114 = arith.mulf %104, %113 : vector<8x32xf32>
    %c0_37 = arith.constant 0 : index
    %c0_38 = arith.constant 0 : index
    %115 = vector.load %arg6[%c0_37, %c0_38] : memref<1x32xf32, #tpu.memory_space<vmem>>, vector<1x32xf32>
    %116 = vector.broadcast %115 : vector<1x32xf32> to vector<8x32xf32>
    %117 = arith.mulf %114, %116 : vector<8x32xf32>
    %c0_39 = arith.constant 0 : index
    %c0_40 = arith.constant 0 : index
    %118 = vector.load %arg7[%c0_39, %c0_40] : memref<1x32xf32, #tpu.memory_space<vmem>>, vector<1x32xf32>
    %119 = vector.broadcast %118 : vector<1x32xf32> to vector<8x32xf32>
    %120 = arith.addf %117, %119 : vector<8x32xf32>
    %c0_41 = arith.constant 0 : index
    %c0_42 = arith.constant 0 : index
    %c0_43 = arith.constant 0 : index
    %121 = vector.load %arg8[%c0_41, %c0_42, %c0_43] : memref<1x8x32xf32, #tpu.memory_space<vmem>>, vector<1x8x32xf32>
    %122 = vector.shape_cast %121 : vector<1x8x32xf32> to vector<8x32xf32>
    %123 = vector.shape_cast %120 : vector<8x32xf32> to vector<1x8x32xf32>
    tpu.vector_store %arg8[%c0_41, %c0_42, %c0_43], %123 {strides = array<i32>} : memref<1x8x32xf32, #tpu.memory_space<vmem>>, vector<1x8x32xf32>,
    return
  }
  func.func @transform_0(%arg0: i32) -> (i32, i32, i32) {
    %c0_i32 = arith.constant 0 : i32
    %c0_i32_0 = arith.constant 0 : i32
    %c0_i32_1 = arith.constant 0 : i32
    return %arg0, %c0_i32, %c0_i32_0 : i32, i32, i32
  }
  func.func @transform_1(%arg0: i32) -> (i32, i32) {
    %c0_i32 = arith.constant 0 : i32
    %c0_i32_0 = arith.constant 0 : i32
    %c0_i32_1 = arith.constant 0 : i32
    return %c0_i32, %c0_i32_0 : i32, i32
  }
  func.func @transform_2(%arg0: i32) -> (i32, i32) {
    %c0_i32 = arith.constant 0 : i32
    %c0_i32_0 = arith.constant 0 : i32
    %c0_i32_1 = arith.constant 0 : i32
    return %c0_i32, %c0_i32_0 : i32, i32
  }
  func.func @transform_3(%arg0: i32) -> (i32, i32) {
    %c0_i32 = arith.constant 0 : i32
    %c0_i32_0 = arith.constant 0 : i32
    %c0_i32_1 = arith.constant 0 : i32
    return %c0_i32, %c0_i32_0 : i32, i32
  }
  func.func @transform_4(%arg0: i32) -> (i32, i32) {
    %c0_i32 = arith.constant 0 : i32
    %c0_i32_0 = arith.constant 0 : i32
    %c0_i32_1 = arith.constant 0 : i32
    return %c0_i32, %c0_i32_0 : i32, i32
  }
  func.func @transform_5(%arg0: i32) -> (i32, i32) {
    %c0_i32 = arith.constant 0 : i32
    %c0_i32_0 = arith.constant 0 : i32
    %c0_i32_1 = arith.constant 0 : i32
    return %c0_i32, %c0_i32_0 : i32, i32
  }
  func.func @transform_6(%arg0: i32) -> (i32, i32) {
    %c0_i32 = arith.constant 0 : i32
    %c0_i32_0 = arith.constant 0 : i32
    %c0_i32_1 = arith.constant 0 : i32
    return %c0_i32, %c0_i32_0 : i32, i32
  }
  func.func @transform_7(%arg0: i32) -> (i32, i32, i32) {
    %c0_i32 = arith.constant 0 : i32
    %c0_i32_0 = arith.constant 0 : i32
    %c0_i32_1 = arith.constant 0 : i32
    return %arg0, %c0_i32, %c0_i32_0 : i32, i32, i32
  }
}

module attributes {stable_mosaic.version = 11 : i64} {
  func.func @_cross_attn_mlp_kernel(%arg0: i32, %arg1: memref<1x8x32xf32, #tpu.memory_space<vmem>>, %arg2: memref<1x8x32xf32, #tpu.memory_space<vmem>>, %arg3: memref<32x32xbf16, #tpu.memory_space<vmem>>, %arg4: memref<1x32xf32, #tpu.memory_space<vmem>>, %arg5: memref<32x64xbf16, #tpu.memory_space<vmem>>, %arg6: memref<1x64xf32, #tpu.memory_space<vmem>>, %arg7: memref<32x32xbf16, #tpu.memory_space<vmem>>, %arg8: memref<1x32xf32, #tpu.memory_space<vmem>>, %arg9: memref<1x32xf32, #tpu.memory_space<vmem>>, %arg10: memref<1x32xf32, #tpu.memory_space<vmem>>, %arg11: memref<32x128xbf16, #tpu.memory_space<vmem>>, %arg12: memref<1x128xf32, #tpu.memory_space<vmem>>, %arg13: memref<128x32xbf16, #tpu.memory_space<vmem>>, %arg14: memref<1x32xf32, #tpu.memory_space<vmem>>, %arg15: memref<1x8x32xf32, #tpu.memory_space<vmem>>) attributes {dimension_semantics = [#tpu.dimension_semantics<parallel>], iteration_bounds = array<i64: 2>, scalar_prefetch = 0 : i64, scratch_operands = 0 : i64, tpu.core_type = #tpu.core_type<tc>, window_params = [{transform_indices = @transform_0, window_bounds = array<i64: 1, 8, 32>}, {transform_indices = @transform_1, window_bounds = array<i64: 1, 8, 32>}, {pipeline_mode = #tpu.pipeline_mode<synchronous>, transform_indices = @transform_2, window_bounds = array<i64: 32, 32>}, {pipeline_mode = #tpu.pipeline_mode<synchronous>, transform_indices = @transform_3, window_bounds = array<i64: 1, 32>}, {pipeline_mode = #tpu.pipeline_mode<synchronous>, transform_indices = @transform_4, window_bounds = array<i64: 32, 64>}, {pipeline_mode = #tpu.pipeline_mode<synchronous>, transform_indices = @transform_5, window_bounds = array<i64: 1, 64>}, {pipeline_mode = #tpu.pipeline_mode<synchronous>, transform_indices = @transform_6, window_bounds = array<i64: 32, 32>}, {pipeline_mode = #tpu.pipeline_mode<synchronous>, transform_indices = @transform_7, window_bounds = array<i64: 1, 32>}, {pipeline_mode = #tpu.pipeline_mode<synchronous>, transform_indices = @transform_8, window_bounds = array<i64: 1, 32>}, {pipeline_mode = #tpu.pipeline_mode<synchronous>, transform_indices = @transform_9, window_bounds = array<i64: 1, 32>}, {pipeline_mode = #tpu.pipeline_mode<synchronous>, transform_indices = @transform_10, window_bounds = array<i64: 32, 128>}, {pipeline_mode = #tpu.pipeline_mode<synchronous>, transform_indices = @transform_11, window_bounds = array<i64: 1, 128>}, {pipeline_mode = #tpu.pipeline_mode<synchronous>, transform_indices = @transform_12, window_bounds = array<i64: 128, 32>}, {pipeline_mode = #tpu.pipeline_mode<synchronous>, transform_indices = @transform_13, window_bounds = array<i64: 1, 32>}, {transform_indices = @transform_14, window_bounds = array<i64: 1, 8, 32>}]} {
    %c0 = arith.constant 0 : index
    %c0_0 = arith.constant 0 : index
    %c0_1 = arith.constant 0 : index
    %0 = vector.load %arg1[%c0, %c0_0, %c0_1] : memref<1x8x32xf32, #tpu.memory_space<vmem>>, vector<1x8x32xf32>
    %1 = vector.shape_cast %0 : vector<1x8x32xf32> to vector<8x32xf32>
    %c0_2 = arith.constant 0 : index
    %c0_3 = arith.constant 0 : index
    %c0_4 = arith.constant 0 : index
    %2 = vector.load %arg2[%c0_2, %c0_3, %c0_4] : memref<1x8x32xf32, #tpu.memory_space<vmem>>, vector<1x8x32xf32>
    %3 = vector.shape_cast %2 : vector<1x8x32xf32> to vector<8x32xf32>
    %4 = arith.truncf %1 : vector<8x32xf32> to vector<8x32xbf16>
    %c0_5 = arith.constant 0 : index
    %c0_6 = arith.constant 0 : index
    %5 = vector.load %arg3[%c0_5, %c0_6] : memref<32x32xbf16, #tpu.memory_space<vmem>>, vector<32x32xbf16>
    %cst = arith.constant dense<0.000000e+00> : vector<8x32xf32>
    %6 = tpu.matmul %4, %5, %cst {dimension_numbers = #tpu.dot_dimension_numbers<[1], [0], [0], [1], [0, 0, 1, 1], [], []>} : vector<8x32xbf16>, vector<32x32xbf16>, vector<8x32xf32> -> vector<8x32xf32>
    %c0_7 = arith.constant 0 : index
    %c0_8 = arith.constant 0 : index
    %7 = vector.load %arg4[%c0_7, %c0_8] : memref<1x32xf32, #tpu.memory_space<vmem>>, vector<1x32xf32>
    %8 = vector.broadcast %7 : vector<1x32xf32> to vector<8x32xf32>
    %9 = arith.addf %6, %8 : vector<8x32xf32>
    %10 = arith.truncf %3 : vector<8x32xf32> to vector<8x32xbf16>
    %c0_9 = arith.constant 0 : index
    %c0_10 = arith.constant 0 : index
    %11 = vector.load %arg5[%c0_9, %c0_10] : memref<32x64xbf16, #tpu.memory_space<vmem>>, vector<32x64xbf16>
    %cst_11 = arith.constant dense<0.000000e+00> : vector<8x64xf32>
    %12 = tpu.matmul %10, %11, %cst_11 {dimension_numbers = #tpu.dot_dimension_numbers<[1], [0], [0], [1], [0, 0, 1, 1], [], []>} : vector<8x32xbf16>, vector<32x64xbf16>, vector<8x64xf32> -> vector<8x64xf32>
    %c0_12 = arith.constant 0 : index
    %c0_13 = arith.constant 0 : index
    %13 = vector.load %arg6[%c0_12, %c0_13] : memref<1x64xf32, #tpu.memory_space<vmem>>, vector<1x64xf32>
    %14 = vector.broadcast %13 : vector<1x64xf32> to vector<8x64xf32>
    %15 = arith.addf %12, %14 : vector<8x64xf32>
    %cst_14 = arith.constant 0.353553385 : f32
    %16 = vector.broadcast %cst_14 : f32 to vector<8x32xf32>
    %17 = arith.mulf %9, %16 : vector<8x32xf32>
    %18 = arith.truncf %17 : vector<8x32xf32> to vector<8x32xbf16>
    %19 = vector.extract_strided_slice %15 {offsets = [0, 0], sizes = [8, 32], strides = [1, 1]} : vector<8x64xf32> to vector<8x32xf32>
    %20 = arith.truncf %19 : vector<8x32xf32> to vector<8x32xbf16>
    %21 = vector.extract_strided_slice %15 {offsets = [0, 32], sizes = [8, 32], strides = [1, 1]} : vector<8x64xf32> to vector<8x32xf32>
    %22 = arith.truncf %21 : vector<8x32xf32> to vector<8x32xbf16>
    %23 = vector.extract_strided_slice %18 {offsets = [0, 0], sizes = [8, 8], strides = [1, 1]} : vector<8x32xbf16> to vector<8x8xbf16>
    %24 = vector.extract_strided_slice %20 {offsets = [0, 0], sizes = [8, 8], strides = [1, 1]} : vector<8x32xbf16> to vector<8x8xbf16>
    %25 = vector.extract_strided_slice %22 {offsets = [0, 0], sizes = [8, 8], strides = [1, 1]} : vector<8x32xbf16> to vector<8x8xbf16>
    %cst_15 = arith.constant dense<0.000000e+00> : vector<8x8xf32>
    %26 = tpu.matmul %23, %24, %cst_15 {dimension_numbers = #tpu.dot_dimension_numbers<[1], [1], [0], [0], [0, 0, 1, 0], [], []>} : vector<8x8xbf16>, vector<8x8xbf16>, vector<8x8xf32> -> vector<8x8xf32>
    %cst_16 = arith.constant dense<0xFF800000> : vector<8xf32>
    %27 = vector.multi_reduction <maximumf>, %26, %cst_16 [1] : vector<8x8xf32> to vector<8xf32>
    %28 = vector.shape_cast %27 : vector<8xf32> to vector<8x1xf32>
    %29 = vector.broadcast %28 : vector<8x1xf32> to vector<8x8xf32>
    %30 = arith.subf %26, %29 : vector<8x8xf32>
    %31 = math.exp %30 : vector<8x8xf32>
    %cst_17 = arith.constant dense<0.000000e+00> : vector<8xf32>
    %32 = vector.multi_reduction <add>, %31, %cst_17 [1] : vector<8x8xf32> to vector<8xf32>
    %33 = vector.shape_cast %32 : vector<8xf32> to vector<8x1xf32>
    %34 = arith.truncf %31 : vector<8x8xf32> to vector<8x8xbf16>
    %cst_18 = arith.constant dense<0.000000e+00> : vector<8x8xf32>
    %35 = tpu.matmul %34, %25, %cst_18 {dimension_numbers = #tpu.dot_dimension_numbers<[1], [0], [0], [1], [0, 0, 1, 1], [], []>} : vector<8x8xbf16>, vector<8x8xbf16>, vector<8x8xf32> -> vector<8x8xf32>
    %36 = tpu.reciprocal %33 {approx = true} : vector<8x1xf32> -> vector<8x1xf32>
    %37 = vector.broadcast %36 : vector<8x1xf32> to vector<8x8xf32>
    %38 = arith.mulf %35, %37 : vector<8x8xf32>
    %39 = vector.extract_strided_slice %18 {offsets = [0, 8], sizes = [8, 8], strides = [1, 1]} : vector<8x32xbf16> to vector<8x8xbf16>
    %40 = vector.extract_strided_slice %20 {offsets = [0, 8], sizes = [8, 8], strides = [1, 1]} : vector<8x32xbf16> to vector<8x8xbf16>
    %41 = vector.extract_strided_slice %22 {offsets = [0, 8], sizes = [8, 8], strides = [1, 1]} : vector<8x32xbf16> to vector<8x8xbf16>
    %cst_19 = arith.constant dense<0.000000e+00> : vector<8x8xf32>
    %42 = tpu.matmul %39, %40, %cst_19 {dimension_numbers = #tpu.dot_dimension_numbers<[1], [1], [0], [0], [0, 0, 1, 0], [], []>} : vector<8x8xbf16>, vector<8x8xbf16>, vector<8x8xf32> -> vector<8x8xf32>
    %cst_20 = arith.constant dense<0xFF800000> : vector<8xf32>
    %43 = vector.multi_reduction <maximumf>, %42, %cst_20 [1] : vector<8x8xf32> to vector<8xf32>
    %44 = vector.shape_cast %43 : vector<8xf32> to vector<8x1xf32>
    %45 = vector.broadcast %44 : vector<8x1xf32> to vector<8x8xf32>
    %46 = arith.subf %42, %45 : vector<8x8xf32>
    %47 = math.exp %46 : vector<8x8xf32>
    %cst_21 = arith.constant dense<0.000000e+00> : vector<8xf32>
    %48 = vector.multi_reduction <add>, %47, %cst_21 [1] : vector<8x8xf32> to vector<8xf32>
    %49 = vector.shape_cast %48 : vector<8xf32> to vector<8x1xf32>
    %50 = arith.truncf %47 : vector<8x8xf32> to vector<8x8xbf16>
    %cst_22 = arith.constant dense<0.000000e+00> : vector<8x8xf32>
    %51 = tpu.matmul %50, %41, %cst_22 {dimension_numbers = #tpu.dot_dimension_numbers<[1], [0], [0], [1], [0, 0, 1, 1], [], []>} : vector<8x8xbf16>, vector<8x8xbf16>, vector<8x8xf32> -> vector<8x8xf32>
    %52 = tpu.reciprocal %49 {approx = true} : vector<8x1xf32> -> vector<8x1xf32>
    %53 = vector.broadcast %52 : vector<8x1xf32> to vector<8x8xf32>
    %54 = arith.mulf %51, %53 : vector<8x8xf32>
    %55 = vector.extract_strided_slice %18 {offsets = [0, 16], sizes = [8, 8], strides = [1, 1]} : vector<8x32xbf16> to vector<8x8xbf16>
    %56 = vector.extract_strided_slice %20 {offsets = [0, 16], sizes = [8, 8], strides = [1, 1]} : vector<8x32xbf16> to vector<8x8xbf16>
    %57 = vector.extract_strided_slice %22 {offsets = [0, 16], sizes = [8, 8], strides = [1, 1]} : vector<8x32xbf16> to vector<8x8xbf16>
    %cst_23 = arith.constant dense<0.000000e+00> : vector<8x8xf32>
    %58 = tpu.matmul %55, %56, %cst_23 {dimension_numbers = #tpu.dot_dimension_numbers<[1], [1], [0], [0], [0, 0, 1, 0], [], []>} : vector<8x8xbf16>, vector<8x8xbf16>, vector<8x8xf32> -> vector<8x8xf32>
    %cst_24 = arith.constant dense<0xFF800000> : vector<8xf32>
    %59 = vector.multi_reduction <maximumf>, %58, %cst_24 [1] : vector<8x8xf32> to vector<8xf32>
    %60 = vector.shape_cast %59 : vector<8xf32> to vector<8x1xf32>
    %61 = vector.broadcast %60 : vector<8x1xf32> to vector<8x8xf32>
    %62 = arith.subf %58, %61 : vector<8x8xf32>
    %63 = math.exp %62 : vector<8x8xf32>
    %cst_25 = arith.constant dense<0.000000e+00> : vector<8xf32>
    %64 = vector.multi_reduction <add>, %63, %cst_25 [1] : vector<8x8xf32> to vector<8xf32>
    %65 = vector.shape_cast %64 : vector<8xf32> to vector<8x1xf32>
    %66 = arith.truncf %63 : vector<8x8xf32> to vector<8x8xbf16>
    %cst_26 = arith.constant dense<0.000000e+00> : vector<8x8xf32>
    %67 = tpu.matmul %66, %57, %cst_26 {dimension_numbers = #tpu.dot_dimension_numbers<[1], [0], [0], [1], [0, 0, 1, 1], [], []>} : vector<8x8xbf16>, vector<8x8xbf16>, vector<8x8xf32> -> vector<8x8xf32>
    %68 = tpu.reciprocal %65 {approx = true} : vector<8x1xf32> -> vector<8x1xf32>
    %69 = vector.broadcast %68 : vector<8x1xf32> to vector<8x8xf32>
    %70 = arith.mulf %67, %69 : vector<8x8xf32>
    %71 = vector.extract_strided_slice %18 {offsets = [0, 24], sizes = [8, 8], strides = [1, 1]} : vector<8x32xbf16> to vector<8x8xbf16>
    %72 = vector.extract_strided_slice %20 {offsets = [0, 24], sizes = [8, 8], strides = [1, 1]} : vector<8x32xbf16> to vector<8x8xbf16>
    %73 = vector.extract_strided_slice %22 {offsets = [0, 24], sizes = [8, 8], strides = [1, 1]} : vector<8x32xbf16> to vector<8x8xbf16>
    %cst_27 = arith.constant dense<0.000000e+00> : vector<8x8xf32>
    %74 = tpu.matmul %71, %72, %cst_27 {dimension_numbers = #tpu.dot_dimension_numbers<[1], [1], [0], [0], [0, 0, 1, 0], [], []>} : vector<8x8xbf16>, vector<8x8xbf16>, vector<8x8xf32> -> vector<8x8xf32>
    %cst_28 = arith.constant dense<0xFF800000> : vector<8xf32>
    %75 = vector.multi_reduction <maximumf>, %74, %cst_28 [1] : vector<8x8xf32> to vector<8xf32>
    %76 = vector.shape_cast %75 : vector<8xf32> to vector<8x1xf32>
    %77 = vector.broadcast %76 : vector<8x1xf32> to vector<8x8xf32>
    %78 = arith.subf %74, %77 : vector<8x8xf32>
    %79 = math.exp %78 : vector<8x8xf32>
    %cst_29 = arith.constant dense<0.000000e+00> : vector<8xf32>
    %80 = vector.multi_reduction <add>, %79, %cst_29 [1] : vector<8x8xf32> to vector<8xf32>
    %81 = vector.shape_cast %80 : vector<8xf32> to vector<8x1xf32>
    %82 = arith.truncf %79 : vector<8x8xf32> to vector<8x8xbf16>
    %cst_30 = arith.constant dense<0.000000e+00> : vector<8x8xf32>
    %83 = tpu.matmul %82, %73, %cst_30 {dimension_numbers = #tpu.dot_dimension_numbers<[1], [0], [0], [1], [0, 0, 1, 1], [], []>} : vector<8x8xbf16>, vector<8x8xbf16>, vector<8x8xf32> -> vector<8x8xf32>
    %84 = tpu.reciprocal %81 {approx = true} : vector<8x1xf32> -> vector<8x1xf32>
    %85 = vector.broadcast %84 : vector<8x1xf32> to vector<8x8xf32>
    %86 = arith.mulf %83, %85 : vector<8x8xf32>
    %87 = tpu.concatenate %38, %54, %70, %86 in 1 : vector<8x8xf32>, vector<8x8xf32>, vector<8x8xf32>, vector<8x8xf32> -> vector<8x32xf32>
    %88 = arith.truncf %87 : vector<8x32xf32> to vector<8x32xbf16>
    %c0_31 = arith.constant 0 : index
    %c0_32 = arith.constant 0 : index
    %89 = vector.load %arg7[%c0_31, %c0_32] : memref<32x32xbf16, #tpu.memory_space<vmem>>, vector<32x32xbf16>
    %cst_33 = arith.constant dense<0.000000e+00> : vector<8x32xf32>
    %90 = tpu.matmul %88, %89, %cst_33 {dimension_numbers = #tpu.dot_dimension_numbers<[1], [0], [0], [1], [0, 0, 1, 1], [], []>} : vector<8x32xbf16>, vector<32x32xbf16>, vector<8x32xf32> -> vector<8x32xf32>
    %c0_34 = arith.constant 0 : index
    %c0_35 = arith.constant 0 : index
    %91 = vector.load %arg8[%c0_34, %c0_35] : memref<1x32xf32, #tpu.memory_space<vmem>>, vector<1x32xf32>
    %92 = vector.broadcast %91 : vector<1x32xf32> to vector<8x32xf32>
    %93 = arith.addf %90, %92 : vector<8x32xf32>
    %94 = arith.addf %93, %1 : vector<8x32xf32>
    %cst_36 = arith.constant dense<0.000000e+00> : vector<8xf32>
    %95 = vector.multi_reduction <add>, %94, %cst_36 [1] : vector<8x32xf32> to vector<8xf32>
    %96 = vector.shape_cast %95 : vector<8xf32> to vector<8x1xf32>
    %cst_37 = arith.constant 3.200000e+01 : f32
    %97 = vector.broadcast %cst_37 : f32 to vector<8x1xf32>
    %98 = arith.divf %96, %97 : vector<8x1xf32>
    %99 = vector.broadcast %98 : vector<8x1xf32> to vector<8x32xf32>
    %100 = arith.subf %94, %99 : vector<8x32xf32>
    %101 = arith.mulf %100, %100 : vector<8x32xf32>
    %cst_38 = arith.constant dense<0.000000e+00> : vector<8xf32>
    %102 = vector.multi_reduction <add>, %101, %cst_38 [1] : vector<8x32xf32> to vector<8xf32>
    %103 = vector.shape_cast %102 : vector<8xf32> to vector<8x1xf32>
    %cst_39 = arith.constant 3.200000e+01 : f32
    %104 = vector.broadcast %cst_39 : f32 to vector<8x1xf32>
    %105 = arith.divf %103, %104 : vector<8x1xf32>
    %cst_40 = arith.constant 9.99999974E-6 : f32
    %106 = vector.broadcast %cst_40 : f32 to vector<8x1xf32>
    %107 = arith.addf %105, %106 : vector<8x1xf32>
    %108 = math.rsqrt %107 : vector<8x1xf32>
    %109 = vector.broadcast %108 : vector<8x1xf32> to vector<8x32xf32>
    %110 = arith.mulf %100, %109 : vector<8x32xf32>
    %c0_41 = arith.constant 0 : index
    %c0_42 = arith.constant 0 : index
    %111 = vector.load %arg9[%c0_41, %c0_42] : memref<1x32xf32, #tpu.memory_space<vmem>>, vector<1x32xf32>
    %112 = vector.broadcast %111 : vector<1x32xf32> to vector<8x32xf32>
    %113 = arith.mulf %110, %112 : vector<8x32xf32>
    %c0_43 = arith.constant 0 : index
    %c0_44 = arith.constant 0 : index
    %114 = vector.load %arg10[%c0_43, %c0_44] : memref<1x32xf32, #tpu.memory_space<vmem>>, vector<1x32xf32>
    %115 = vector.broadcast %114 : vector<1x32xf32> to vector<8x32xf32>
    %116 = arith.addf %113, %115 : vector<8x32xf32>
    %117 = arith.truncf %116 : vector<8x32xf32> to vector<8x32xbf16>
    %c0_45 = arith.constant 0 : index
    %c0_46 = arith.constant 0 : index
    %118 = vector.load %arg11[%c0_45, %c0_46] : memref<32x128xbf16, #tpu.memory_space<vmem>>, vector<32x128xbf16>
    %cst_47 = arith.constant dense<0.000000e+00> : vector<8x128xf32>
    %119 = tpu.matmul %117, %118, %cst_47 {dimension_numbers = #tpu.dot_dimension_numbers<[1], [0], [0], [1], [0, 0, 1, 1], [], []>} : vector<8x32xbf16>, vector<32x128xbf16>, vector<8x128xf32> -> vector<8x128xf32>
    %c0_48 = arith.constant 0 : index
    %c0_49 = arith.constant 0 : index
    %120 = vector.load %arg12[%c0_48, %c0_49] : memref<1x128xf32, #tpu.memory_space<vmem>>, vector<1x128xf32>
    %121 = vector.broadcast %120 : vector<1x128xf32> to vector<8x128xf32>
    %122 = arith.addf %119, %121 : vector<8x128xf32>
    %123 = arith.mulf %122, %122 : vector<8x128xf32>
    %124 = arith.mulf %122, %123 : vector<8x128xf32>
    %cst_50 = arith.constant 4.471500e-02 : f32
    %125 = vector.broadcast %cst_50 : f32 to vector<8x128xf32>
    %126 = arith.mulf %125, %124 : vector<8x128xf32>
    %127 = arith.addf %122, %126 : vector<8x128xf32>
    %cst_51 = arith.constant 0.797884583 : f32
    %128 = vector.broadcast %cst_51 : f32 to vector<8x128xf32>
    %129 = arith.mulf %128, %127 : vector<8x128xf32>
    %130 = math.tanh %129 : vector<8x128xf32>
    %cst_52 = arith.constant 1.000000e+00 : f32
    %131 = vector.broadcast %cst_52 : f32 to vector<8x128xf32>
    %132 = arith.addf %131, %130 : vector<8x128xf32>
    %cst_53 = arith.constant 5.000000e-01 : f32
    %133 = vector.broadcast %cst_53 : f32 to vector<8x128xf32>
    %134 = arith.mulf %133, %132 : vector<8x128xf32>
    %135 = arith.mulf %122, %134 : vector<8x128xf32>
    %136 = arith.truncf %135 : vector<8x128xf32> to vector<8x128xbf16>
    %c0_54 = arith.constant 0 : index
    %c0_55 = arith.constant 0 : index
    %137 = vector.load %arg13[%c0_54, %c0_55] : memref<128x32xbf16, #tpu.memory_space<vmem>>, vector<128x32xbf16>
    %cst_56 = arith.constant dense<0.000000e+00> : vector<8x32xf32>
    %138 = tpu.matmul %136, %137, %cst_56 {dimension_numbers = #tpu.dot_dimension_numbers<[1], [0], [0], [1], [0, 0, 1, 1], [], []>} : vector<8x128xbf16>, vector<128x32xbf16>, vector<8x32xf32> -> vector<8x32xf32>
    %c0_57 = arith.constant 0 : index
    %c0_58 = arith.constant 0 : index
    %139 = vector.load %arg14[%c0_57, %c0_58] : memref<1x32xf32, #tpu.memory_space<vmem>>, vector<1x32xf32>
    %140 = vector.broadcast %139 : vector<1x32xf32> to vector<8x32xf32>
    %141 = arith.addf %138, %140 : vector<8x32xf32>
    %142 = arith.addf %141, %94 : vector<8x32xf32>
    %c0_59 = arith.constant 0 : index
    %c0_60 = arith.constant 0 : index
    %c0_61 = arith.constant 0 : index
    %143 = vector.load %arg15[%c0_59, %c0_60, %c0_61] : memref<1x8x32xf32, #tpu.memory_space<vmem>>, vector<1x8x32xf32>
    %144 = vector.shape_cast %143 : vector<1x8x32xf32> to vector<8x32xf32>
    %145 = vector.shape_cast %142 : vector<8x32xf32> to vector<1x8x32xf32>
    tpu.vector_store %arg15[%c0_59, %c0_60, %c0_61], %145 {strides = array<i32>} : memref<1x8x32xf32, #tpu.memory_space<vmem>>, vector<1x8x32xf32>,
    return
  }
  func.func @transform_0(%arg0: i32) -> (i32, i32, i32) {
    %c0_i32 = arith.constant 0 : i32
    %c0_i32_0 = arith.constant 0 : i32
    %c0_i32_1 = arith.constant 0 : i32
    return %arg0, %c0_i32, %c0_i32_0 : i32, i32, i32
  }
  func.func @transform_1(%arg0: i32) -> (i32, i32, i32) {
    %c0_i32 = arith.constant 0 : i32
    %c0_i32_0 = arith.constant 0 : i32
    %c0_i32_1 = arith.constant 0 : i32
    return %arg0, %c0_i32, %c0_i32_0 : i32, i32, i32
  }
  func.func @transform_2(%arg0: i32) -> (i32, i32) {
    %c0_i32 = arith.constant 0 : i32
    %c0_i32_0 = arith.constant 0 : i32
    %c0_i32_1 = arith.constant 0 : i32
    return %c0_i32, %c0_i32_0 : i32, i32
  }
  func.func @transform_3(%arg0: i32) -> (i32, i32) {
    %c0_i32 = arith.constant 0 : i32
    %c0_i32_0 = arith.constant 0 : i32
    %c0_i32_1 = arith.constant 0 : i32
    return %c0_i32, %c0_i32_0 : i32, i32
  }
  func.func @transform_4(%arg0: i32) -> (i32, i32) {
    %c0_i32 = arith.constant 0 : i32
    %c0_i32_0 = arith.constant 0 : i32
    %c0_i32_1 = arith.constant 0 : i32
    return %c0_i32, %c0_i32_0 : i32, i32
  }
  func.func @transform_5(%arg0: i32) -> (i32, i32) {
    %c0_i32 = arith.constant 0 : i32
    %c0_i32_0 = arith.constant 0 : i32
    %c0_i32_1 = arith.constant 0 : i32
    return %c0_i32, %c0_i32_0 : i32, i32
  }
  func.func @transform_6(%arg0: i32) -> (i32, i32) {
    %c0_i32 = arith.constant 0 : i32
    %c0_i32_0 = arith.constant 0 : i32
    %c0_i32_1 = arith.constant 0 : i32
    return %c0_i32, %c0_i32_0 : i32, i32
  }
  func.func @transform_7(%arg0: i32) -> (i32, i32) {
    %c0_i32 = arith.constant 0 : i32
    %c0_i32_0 = arith.constant 0 : i32
    %c0_i32_1 = arith.constant 0 : i32
    return %c0_i32, %c0_i32_0 : i32, i32
  }
  func.func @transform_8(%arg0: i32) -> (i32, i32) {
    %c0_i32 = arith.constant 0 : i32
    %c0_i32_0 = arith.constant 0 : i32
    %c0_i32_1 = arith.constant 0 : i32
    return %c0_i32, %c0_i32_0 : i32, i32
  }
  func.func @transform_9(%arg0: i32) -> (i32, i32) {
    %c0_i32 = arith.constant 0 : i32
    %c0_i32_0 = arith.constant 0 : i32
    %c0_i32_1 = arith.constant 0 : i32
    return %c0_i32, %c0_i32_0 : i32, i32
  }
  func.func @transform_10(%arg0: i32) -> (i32, i32) {
    %c0_i32 = arith.constant 0 : i32
    %c0_i32_0 = arith.constant 0 : i32
    %c0_i32_1 = arith.constant 0 : i32
    return %c0_i32, %c0_i32_0 : i32, i32
  }
  func.func @transform_11(%arg0: i32) -> (i32, i32) {
    %c0_i32 = arith.constant 0 : i32
    %c0_i32_0 = arith.constant 0 : i32
    %c0_i32_1 = arith.constant 0 : i32
    return %c0_i32, %c0_i32_0 : i32, i32
  }
  func.func @transform_12(%arg0: i32) -> (i32, i32) {
    %c0_i32 = arith.constant 0 : i32
    %c0_i32_0 = arith.constant 0 : i32
    %c0_i32_1 = arith.constant 0 : i32
    return %c0_i32, %c0_i32_0 : i32, i32
  }
  func.func @transform_13(%arg0: i32) -> (i32, i32) {
    %c0_i32 = arith.constant 0 : i32
    %c0_i32_0 = arith.constant 0 : i32
    %c0_i32_1 = arith.constant 0 : i32
    return %c0_i32, %c0_i32_0 : i32, i32
  }
  func.func @transform_14(%arg0: i32) -> (i32, i32, i32) {
    %c0_i32 = arith.constant 0 : i32
    %c0_i32_0 = arith.constant 0 : i32
    %c0_i32_1 = arith.constant 0 : i32
    return %arg0, %c0_i32, %c0_i32_0 : i32, i32, i32
  }
}

</mosaic_0001>

<bundles_post_ra>
// kernel: decoder_forward.2
= control target key start
LH: loop header
LB: loop body
LE: loop exit
PB: predicated region body
PF: predicated region fallthrough
CT: control target
= control target key end

     0   :  { %12 = vsyncpa [#allocation3], 0  ;;  %s1827_s0 = inlined_call_operand.hbm [shape: f32[2,8,32], index: 0, kind: input, shape index: {}]   ;;  %s1828_s1 = inlined_call_operand.vmem [shape: bf16[32,96], index: 1, kind: input, shape index: {}]   ;;  %s1829_s2 = inlined_call_operand.hbm [shape: f32[1,96], index: 2, kind: input, shape index: {}]   ;;  %s1830_s3 = inlined_call_operand.vmem [shape: bf16[32,32], index: 3, kind: input, shape index: {}]   ;;  %s1831_s4 = inlined_call_operand.hbm [shape: f32[1,32], index: 4, kind: input, shape index: {}]   ;;  %s1832_s5 = inlined_call_operand.hbm [shape: f32[1,32], index: 5, kind: input, shape index: {}]   ;;  %s1833_s6 = inlined_call_operand.hbm [shape: f32[1,32], index: 6, kind: input, shape index: {}]   ;;  %s1834_s7 = inlined_call_operand.vmem [shape: f32[2,8,32], index: 7, kind: output, shape index: {}]  }
   0x1   :  { %14 = vsyncpa [#allocation3 + $0x1], 0 }
   0x2   :  { %15 = vsyncpa [#allocation5], 0 }
   0x3   :  { %16 = vsyncpa [#allocation8], 0  ;;  %s1564_s24 = smov 0   ;;  %s1566_s25 = smov 0  }
   0x4   :  { %s1568_s26 = smov 0   ;;  %s1570_s27 = smov 0  }
   0x5 LB: > { %s1503_s28 = smov [#allocation4]   ;;  %s1585_s30 = sadd.s32 4294967295, %s1501_s27   ;;  %s1501_s27 = sphi %s1570_s27, %s1851_s27   ;;  %s1497_s26 = sphi %s1568_s26, %s1850_s26   ;;  %s1493_s25 = sphi %s1566_s25, %s1849_s25   ;;  %s1489_s24 = sphi %s1564_s24, %s1848_s24  }
   0x6   : > { %s221_s29 = sshll.u32 %s1503_s28, 4  ;;  %p1088_p0 = scmp.ge.s32.totalorder %s1501_s27, 1  ;;  %s222_s29 = int_to_ptr.vmem [resolvable:$true] %s221_s29 }
   0x7   : > { %p1835_p1 = scmp.eq.s32.totalorder %s1585_s30, 0  ;;  %p205_p2 = scmp.lt.s32.totalorder %s1501_s27, 3 }
   0x8   : > { %s1504_s9 = smov [#allocation7]   ;;  %s1505_s11 = smov [#allocation6]  }
   0x9   : > { %p1590_p3 = pnand %p1088_p0, %p205_p2  ;;  %s246_s10 = sshll.u32 %s1504_s9, 4  ;;  %s1596_s10 = int_to_ptr.vmem [resolvable:$true] %s246_s10 }
   0xa   : > { %s235_s12 = sshll.u32 %s1505_s11, 4  ;;  %s1506_s14 = smov [#allocation9]   ;;  %s1604_s12 = int_to_ptr.vmem [resolvable:$true] %s235_s12 }
   0xb   : > { %s1838_s8 = scalar_select %p1590_p3, 1, 0 }
   0xc   : > { %p1227_p4 = pneg %p1590_p3  ;;  %s1606_s15 = sshll.u32 %s1506_s14, 4  ;;  %s258_s15 = int_to_ptr.vmem [resolvable:$true] %s1606_s15 }
   0xd   : > { %s1338_s16 = scalar_lea.vmem %s222_s29, 16  ;;  %s1345_s17 = scalar_lea.vmem %s222_s29, 32 }
   0xe   : > { %p1600_p5 = pnand %p1227_p4, %p1835_p1  ;;  %p1339_p7 = scmp.ne.s32.totalorder %s222_s29, %s1338_s16 }
   0xf   : > { %p1346_p10 = scmp.lt.s32.totalorder %s222_s29, %s222_s29  ;;  %p1347_p11 = scmp.lt.s32.totalorder %s1345_s17, %s1338_s16 }
  0x10   : > { %p1329_p6 = pneg %p1600_p5 }
  0x11   : > { %p1348_p12 = por %p1347_p11, %p1346_p10 }
  0x12   : > { %p1341_p8 = pnand %p1339_p7, %p1329_p6 }
  0x14   : > { %p1342_p9 = pneg %p1341_p8 }
  0x16   : > { %p1349_p13 = pnand %p1348_p12, %p1342_p9 }
  0x18   : > { %1352 = shalt.err (!%p1349_p13)
}
  0x19   : > { %1230 = dma.hbm_to_vmem [thread:$0]  (!%p1600_p5), %s1829_s2, 16, %s222_s29, [#allocation5]  }
  0x1a   : > { %s1364_s20 = scalar_lea.vmem %s1596_s10, 16  ;;  %s1371_s21 = scalar_lea.vmem %s1596_s10, 32 }
  0x1b   : > { %p1365_p0 = scmp.ne.s32.totalorder %s1596_s10, %s1364_s20  ;;  %p1372_p7 = scmp.lt.s32.totalorder %s1596_s10, %s1596_s10 }
  0x1c   : > { %p1373_p8 = scmp.lt.s32.totalorder %s1371_s21, %s1364_s20 }
  0x1d   : > { %p1367_p2 = pnand %p1365_p0, %p1329_p6 }
  0x1e   : > { %p1374_p9 = por %p1373_p8, %p1372_p7 }
  0x1f   : > { %p1368_p4 = pneg %p1367_p2 }
  0x21   : > { %p1375_p10 = pnand %p1374_p9, %p1368_p4 }
  0x23   : > { %1378 = shalt.err (!%p1375_p10)
}
  0x24   : > { %1236 = dma.hbm_to_vmem [thread:$0]  (!%p1600_p5), %s1832_s5, 16, %s1596_s10, [#allocation8]  }
  0x25   : > { %s1390_s28 = scalar_lea.vmem %s1604_s12, 16  ;;  %s1397_s29 = scalar_lea.vmem %s1604_s12, 32 }
  0x26   : > { %p1391_p11 = scmp.ne.s32.totalorder %s1604_s12, %s1390_s28  ;;  %p1398_p0 = scmp.lt.s32.totalorder %s1604_s12, %s1604_s12 }
  0x27   : > { %p1399_p2 = scmp.lt.s32.totalorder %s1397_s29, %s1390_s28 }
  0x28   : > { %p1393_p12 = pnand %p1391_p11, %p1329_p6 }
  0x29   : > { %p1400_p4 = por %p1399_p2, %p1398_p0 }
  0x2a   : > { %p1394_p13 = pneg %p1393_p12 }
  0x2c   : > { %p1401_p7 = pnand %p1400_p4, %p1394_p13 }
  0x2e   : > { %1404 = shalt.err (!%p1401_p7)
}
  0x2f   : > { %1233 = dma.hbm_to_vmem [thread:$0]  (!%p1600_p5), %s1831_s4, 16, %s1604_s12, [#allocation5]  }
  0x30   : > { %s1416_s10 = scalar_lea.vmem %s258_s15, 16  ;;  %s1423_s14 = scalar_lea.vmem %s258_s15, 32 }
  0x31   : > { %p1417_p8 = scmp.ne.s32.totalorder %s258_s15, %s1416_s10  ;;  %p1424_p11 = scmp.lt.s32.totalorder %s258_s15, %s258_s15 }
  0x32   : > { %p1425_p12 = scmp.lt.s32.totalorder %s1423_s14, %s1416_s10 }
  0x33   : > { %p1419_p9 = pnand %p1417_p8, %p1329_p6 }
  0x34   : > { %p1426_p13 = por %p1425_p12, %p1424_p11 }
  0x35   : > { %p1420_p10 = pneg %p1419_p9 }
  0x37   : > { %p1427_p0 = pnand %p1426_p13, %p1420_p10 }
  0x39   : > { %1430 = shalt.err (!%p1427_p0)
}
  0x3a   : > { %1239 = dma.hbm_to_vmem [thread:$0]  (!%p1600_p5), %s1833_s6, 16, %s258_s15, [#allocation8]  }
  0x3b   : > { %s1656_s12 = sadd.s32 1, %s1501_s27   ;;  %s29_s13 = sadd.s32 1, %s1497_s26 }
  0x3c   : > { %s26_s18 = ssub.s32 %s1501_s27, %s1656_s12  ;;  %p36_p6 = scmp.ne.s32.totalorder %s1497_s26, %s1493_s25 }
  0x3d   : > { %p27_p2 = scmp.eq.s32.totalorder %s26_s18, 0  ;;  %p37_p4 = scmp.eq.s32.totalorder %s1501_s27, 0 }
  0x3e   : > { %p42_p7 = scmp.ne.s32.totalorder %s1493_s25, %s1489_s24  ;;  %p1248_p8 = scmp.lt.s32.totalorder %s1501_s27, 2 }
  0x3f   : > { %s1668_s19 = scalar_select %p27_p2, %s1497_s26, %s29_s13  }
  0x40   : > { %p38_p9 = por %p37_p4, %p36_p6  ;;  %p1672_p10 = por %p1835_p1, %p42_p7 }
  0x41   : > { %s268_s21 = sand.u32 1, %s1497_s26   ;;  %s1095_s15 = sshll.u32 %s1501_s27, 7 }
  0x42   : > { %s1840_s20 = scalar_select %p1672_p10, 1, 0 }
  0x43   : > { %s1094_s22 = sshll.u32 %s268_s21, 3  ;;  %s1681_s29 = scalar_lea.hbm %s1827_s0, %s1095_s15 }
  0x44   : > { %s272_s24 = scalar_lea.vmem [#allocation2], %s1094_s22  ;;  %p1683_p5 = pnand %p1248_p8, %p38_p9 }
  0x45   : > { %s279_s9 = sshll.u32 %s272_s24, 4  ;;  %s269_s10 = scalar_lea.sflag [#allocation3], %s268_s21  ;;  %s280_s9 = int_to_ptr.vmem [resolvable:$true] %s279_s9 }
  0x46   : > { %s1431_s14 = scalar_lea.hbm %s1681_s29, 128  ;;  %p1433_p12 = pneg %p1683_p5 }
  0x47   : > { %p1432_p11 = scmp.ne.s32.totalorder %s1681_s29, %s1431_s14  ;;  %s1436_s17 = scalar_lea.hbm %s1827_s0, 256 }
  0x48   : > { %p1437_p6 = scmp.lt.s32.totalorder %s1681_s29, %s1827_s0  ;;  %p1438_p2 = scmp.lt.s32.totalorder %s1436_s17, %s1431_s14 }
  0x49   : > { %p1434_p13 = pnand %p1433_p12, %p1432_p11 }
  0x4a   : > { %p1439_p4 = por %p1438_p2, %p1437_p6 }
  0x4b   : > { %p1435_p0 = pneg %p1434_p13 }
  0x4d   : > { %p1440_p7 = pnand %p1439_p4, %p1435_p0 }
  0x4f   : > { %1443 = shalt.err (!%p1440_p7)
}
  0x50   : > { %s1444_s15 = scalar_lea.vmem %s280_s9, 128  ;;  %s1507_s21 = smov [#allocation2]  }
  0x51   : > { %p1445_p8 = scmp.ne.s32.totalorder %s280_s9, %s1444_s15  ;;  %s1449_s22 = sshll.u32 %s1507_s21, 4  ;;  %s1450_s22 = int_to_ptr.vmem [resolvable:$false] %s1449_s22 }
  0x52   : > { %s1451_s23 = scalar_lea.vmem %s1450_s22, 256  ;;  %p1452_p11 = scmp.lt.s32.totalorder %s280_s9, %s1450_s22 }
  0x53   : > { %p1447_p9 = pnand %p1445_p8, %p1433_p12  ;;  %p1453_p13 = scmp.lt.s32.totalorder %s1451_s23, %s1444_s15 }
  0x55   : > { %p1448_p1 = pneg %p1447_p9  ;;  %p1454_p10 = por %p1453_p13, %p1452_p11 }
  0x57   : > { %p1455_p3 = pnand %p1454_p10, %p1448_p1 }
  0x59   : > { %1458 = shalt.err (!%p1455_p3)
}
  0x5a   : > { %1243 = dma.hbm_to_vmem [thread:$0]  (!%p1683_p5), %s1681_s29, 128, %s280_s9, %s269_s10  }
  0x5b   : > { %p1842_p0 = scmp.ne.s32.totalorder %s1838_s8, 0 }
  0x5c   : > { %s290_s28 = sand.u32 (!%p1842_p0), 1, %s1493_s25   ;;  %p1843_p12 = scmp.ne.s32.totalorder (!%p1842_p0), %s1840_s20, 0 }
  0x5d   : > { %288 = sbr.rel (%p1842_p0) target bundleno = 1660 (0x67c), region = 48  ;;  %s1097_s24 = sshll.u32 (!%p1842_p0), %s290_s28, 3 }
  0x5e   : > { %s291_s14 = scalar_lea.sflag (!%p1842_p0), [#allocation3], %s290_s28  ;;  %s294_s27 = scalar_lea.vmem (!%p1842_p0), [#allocation2], %s1097_s24 }
  0x62   : > { %1476 = dma.done.wait (%p1843_p12), %s291_s14, 128  }
  0x63   : > { %1478 = vsyncadd (%p1843_p12), %s291_s14, 4294967168  ;;  %p1844_p1 = scmp.eq.s32.totalorder %s1585_s30, 0 }
  0x65   : > { %1480 = dma.done.wait (%p1844_p1), [#allocation5], 32   ;;  %p1845_p3 = pmov %p1844_p1 }
  0x66   : > { %p1846_p10 = pmov %p1844_p1 }
  0x67   : > { %1482 = vsyncadd (%p1845_p3), [#allocation5], 4294967264 }
  0x68   : > { %1484 = dma.done.wait (%p1846_p10), [#allocation8], 32   ;;  %p1847_p5 = pmov %p1844_p1 }
  0x69   : > { %v1508_v0 = vmov 0.0   ;;  %vm1509_vm0 = vmmov 0   ;;  %v1305_v1 = vld [vmem:[%s1828_s1 + $0x8] sm:$0xff]   ;;  %v1306_v2 = vld [vmem:[%s1828_s1] sm:$0xff]   ;;  %vm370_vm1 = vcmask 261120   ;;  %s1510_s11 = smov 96   ;;  %v417_v25 = vlaneseq }
  0x6a   : > { %1486 = vsyncadd (%p1847_p5), [#allocation8], 4294967264  ;;  %1145 = vmatprep.subr.bf16.mxu0 %v1508_v0  ;;  %1149 = vmatprep.mubr.msk.bf16.mxu0 %vm1509_vm0, %v1508_v0  ;;  %v1728_v3 = vld [vmem:[%s294_s27] sm:$0xff]  ;;  %v1103_v5 = vld [vmem:[#allocation4] ss:$0 sm:$0xff]  ;;  %s1511_s10 = smov 120  }
  0x6b   : > { %1153 = vmatprep.subr.bf16.mxu1 %v1508_v0  ;;  %1155 = vmatprep.mubr.msk.bf16.mxu1 %vm1509_vm0, %v1508_v0  ;;  %v346_v4 = vpack.c.bf16 %v1728_v3, %v1728_v3  ;;  %s1512_s16 = smov 88   ;;  %s1513_s17 = smov 80   ;;  %vm425_vm2 = vcmask 64512   ;;  %v418_v26 = vshrl.u32 %v417_v25, 7  ;;  %v420_v27 = vand.u32 127, %v417_v25 }
  0x6c   : > { %1146 = vmatpush3.bf16.msra.mxu0 %v1305_v1  ;;  %s1514_s13 = smov 112   ;;  %s1515_s18 = smov 72   ;;  %vm488_vm4 = vcmask 1043456   ;;  %vm881_vm5 = vcmask 130048   ;;  %vm883_vm6 = vcmask 195584  }
  0x6d   : > { %1147 = vmatprep.subr.bf16.mxu0 %v1508_v0  ;;  %s1516_s15 = smov 104   ;;  %vm421_vm3 = vcmp.le.s32.totalorder %v420_v27, %v418_v26  ;;  %s1517_s21 = smov 56  }
  0x6e   : > { %s1518_s22 = smov 64   ;;  %s1519_s23 = smov 40  }
  0x6f   : > { %s1520_s28 = smov 48   ;;  %s1521_s24 = smov 8  }
  0x70   : > { %1148 = vmatpush3.bf16.msra.mxu0 %v1306_v2  ;;  %s1522_s29 = smov 16   ;;  %s1523_s9 = smov 24  }
  0x71   : > { %1159 = vmatprep.subr.bf16.mxu0 %v1508_v0  ;;  %p340_p6 = scmp.lt.s32.totalorder %s1585_s30, 1 }
  0x73   : > { %1150 = vmatmul.mubr.msk.bf16.vlgmr.msra.gmra.mxu0 %vm370_vm1, %v346_v4  ;;  %s1853_s30 = smov (!%p340_p6, %s1585_s30), 1 }
  0x74   : > { %1161 = vmatprep.mubr.msk.bf16.mxu0 %vm1509_vm0, %v1508_v0 }
 0x133   : > { %v408_v6 = vpop.f32.mrf.mxu0 }
 0x134   : > { %v409_v7 = vadd.f32 %v1103_v5, %v408_v6 }
 0x135   : > { %v1151_v8 = vpop.f32.mrf.mxu0 }
 0x136   : > { %v414_v9 = vmul.f32 0.35355338, %v409_v7  ;;  %v1737_v10 = vpack.c.bf16 %v409_v7, %v409_v7 }
 0x137   : > { %v411_v11 = vpop.f32.mrf.mxu0 }
 0x138   : > { %v415_v12 = vpack.c.bf16 %v414_v9, %v414_v9  ;;  %423 = vrot.lane.b32.xlu0 %v1737_v10, %s1510_s11  ;;  %s1102_s11 = sshll.u32 %s1853_s30, 3 }
 0x139   : > { %v1152_v13 = vpop.f32.mrf.mxu0 }
 0x13a   : > { %535 = vrot.lane.b32.xlu1 %v415_v12, %s1511_s10 }
 0x13c   : > { %537 = vrot.lane.b32.xlu0 %v1737_v10, %s1512_s16 }
 0x13e   : > { %648 = vrot.lane.b32.xlu1 %v1737_v10, %s1513_s17  ;;  %s343_s17 = scalar_lea.vmem %s1834_s7, %s1102_s11 }
 0x140   : > { %646 = vrot.lane.b32.xlu0 %v415_v12, %s1514_s13 }
 0x142   : > { %759 = vrot.lane.b32.xlu1 %v1737_v10, %s1515_s18 }
 0x144   : > { %757 = vrot.lane.b32.xlu0 %v415_v12, %s1516_s15 }
 0x1aa   : > { %v424_v14 = vpop.permute.xlu0 %423 }
 0x1ab   : > { %v430_v15 = vsel %vm425_vm2, %v424_v14, 0 }
 0x1ac   : > { %1154 = vmatpush3.bf16.xpose.msra.mxu1 %v430_v15  ;;  %v536_v17 = vpop.permute.xlu1 %535 }
 0x1ad   : > { %1165 = vmatprep.subr.bf16.mxu1 %v1508_v0 }
 0x1ae   : > { %v538_v16 = vpop.permute.xlu0 %537 }
 0x1af   : > { %v543_v18 = vsel %vm425_vm2, %v538_v16, 0 }
 0x1b0   : > { %v649_v19 = vpop.permute.xlu1 %648 }
 0x1b1   : > { %v654_v20 = vsel %vm425_vm2, %v649_v19, 0 }
 0x1b2   : > { %v647_v22 = vpop.permute.xlu0 %646 }
 0x1b3   : > { %1156 = vmatmul.mubr.msk.bf16.vlgmr.msra.gmra.mxu1 %vm425_vm2, %v415_v12 }
 0x1b4   : > { %1166 = vmatpush3.bf16.xpose.msra.mxu1 %v543_v18  ;;  %1167 = vmatprep.mubr.msk.bf16.mxu1 %vm1509_vm0, %v1508_v0  ;;  %v760_v21 = vpop.permute.xlu1 %759 }
 0x1b5   : > { %1177 = vmatprep.subr.bf16.mxu1 %v1508_v0  ;;  %v765_v23 = vsel %vm425_vm2, %v760_v21, 0 }
 0x1b6   : > { %v758_v24 = vpop.permute.xlu0 %757 }
 0x1bb   : > { %1168 = vmatmul.mubr.msk.bf16.vlgmr.msra.gmra.mxu1 %vm425_vm2, %v536_v17 }
 0x1bc   : > { %1178 = vmatpush3.bf16.xpose.msra.mxu1 %v654_v20  ;;  %1179 = vmatprep.mubr.msk.bf16.mxu1 %vm1509_vm0, %v1508_v0 }
 0x1bd   : > { %1189 = vmatprep.subr.bf16.mxu1 %v1508_v0 }
 0x1c3   : > { %1180 = vmatmul.mubr.msk.bf16.vlgmr.msra.gmra.mxu1 %vm425_vm2, %v647_v22 }
 0x1c4   : > { %1190 = vmatpush3.bf16.xpose.msra.mxu1 %v765_v23  ;;  %1191 = vmatprep.mubr.msk.bf16.mxu1 %vm1509_vm0, %v1508_v0 }
 0x1c5   : > { %1201 = vmatprep.subr.bf16.mxu1 %v1508_v0 }
 0x1cb   : > { %1192 = vmatmul.mubr.msk.bf16.vlgmr.msra.gmra.mxu1 %vm425_vm2, %v758_v24 }
 0x1cc   : > { %1205 = vmatprep.mubr.msk.bf16.mxu1 %vm1509_vm0, %v1508_v0 }
 0x273   : > { %v466_v28 = vpop.f32.mrf.mxu1 }
 0x274   : > { %v472_v29 = vsel %vm421_vm3, %v466_v28, -1e+30 }
 0x275   : > { %v1157_v30 = vpop.f32.mrf.mxu1  ;;  %v473_v31 = vsel %vm425_vm2, %v472_v29, -inf }
 0x276   : > { %474 = vmax.xlane.f32.xlu1 %v473_v31 }
 0x277   : > { %v469_v32 = vpop.f32.mrf.mxu1 }
 0x279   : > { %v1158_v33 = vpop.f32.mrf.mxu1 }
 0x27b   : > { %v579_v34 = vpop.f32.mrf.mxu1 }
 0x27c   : > { %v585_v35 = vsel %vm421_vm3, %v579_v34, -1e+30  ;;  %v1307_v34 = vld [vmem:[%s1830_s3 + $0x8] sm:$0xff]  }
 0x27d   : > { %v1169_v36 = vpop.f32.mrf.mxu1  ;;  %v586_v37 = vsel %vm425_vm2, %v585_v35, -inf  ;;  %1202 = vmatpush3.bf16.msra.mxu1 %v1307_v34 }
 0x27e   : > { %587 = vmax.xlane.f32.xlu0 %v586_v37  ;;  %1203 = vmatprep.subr.bf16.mxu1 %v1508_v0 }
 0x27f   : > { %v582_v38 = vpop.f32.mrf.mxu1 }
 0x280   : > { %v1308_v38 = vld [vmem:[%s1830_s3] sm:$0xff]  }
 0x281   : > { %v1170_v39 = vpop.f32.mrf.mxu1  ;;  %1204 = vmatpush3.bf16.msra.mxu1 %v1308_v38 }
 0x283   : > { %v690_v40 = vpop.f32.mrf.mxu1 }
 0x284   : > { %v696_v41 = vsel %vm421_vm3, %v690_v40, -1e+30 }
 0x285   : > { %v1181_v42 = vpop.f32.mrf.mxu1  ;;  %v697_v43 = vsel %vm425_vm2, %v696_v41, -inf }
 0x286   : > { %698 = vmax.xlane.f32.xlu0 %v697_v43 }
 0x287   : > { %596 = vrot.lane.b32.xlu1 %v1737_v10, %s1517_s21  ;;  %v693_v44 = vpop.f32.mrf.mxu1 }
 0x289   : > { %v1182_v45 = vpop.f32.mrf.mxu1 }
 0x28b   : > { %v801_v46 = vpop.f32.mrf.mxu1 }
 0x28c   : > { %v807_v50 = vsel %vm421_vm3, %v801_v46, -1e+30 }
 0x28d   : > { %v1193_v47 = vpop.f32.mrf.mxu1  ;;  %v808_v51 = vsel %vm425_vm2, %v807_v50, -inf }
 0x28f   : > { %v804_v48 = vpop.f32.mrf.mxu1 }
 0x291   : > { %v1194_v49 = vpop.f32.mrf.mxu1 }
 0x29c   : > { %483 = vrot.lane.b32.xlu0 %v1737_v10, %s1518_s22 }
 0x2a0   : > { %818 = vrot.lane.b32.xlu0 %v1737_v10, %s1519_s23 }
 0x2ab   : > { %809 = vmax.xlane.f32.xlu1 %v808_v51 }
 0x2bc   : > { %707 = vrot.lane.b32.xlu1 %v1737_v10, %s1520_s28 }
 0x2ff   : > { %v475_v52 = vpop.xlane.xlu1 %474 }
 0x300   : > { %v476_v53 = vsub.f32 %v472_v29, %v475_v52 }
 0x302   : > { %v477_v54 = vmul.f32 1.442695, %v476_v53 }
 0x303   : > { %v597_v1 = vpop.permute.xlu1 %596 }
 0x304   : > { %1309 = vpow2.f32 %v477_v54  ;;  %v602_v4 = vsel %vm488_vm4, %v597_v1, 0 }
 0x307   : > { %v588_v55 = vpop.xlane.xlu0 %587 }
 0x308   : > { %v589_v56 = vsub.f32 %v585_v35, %v588_v55 }
 0x30a   : > { %v590_v57 = vmul.f32 1.442695, %v589_v56 }
 0x30c   : > { %1311 = vpow2.f32 %v590_v57 }
 0x30f   : > { %v699_v58 = vpop.xlane.xlu0 %698 }
 0x310   : > { %v700_v59 = vsub.f32 %v696_v41, %v699_v58  ;;  %v1115_v58 = vld [vmem:[#allocation6] ss:$0 sm:$0xff] }
 0x311   : > { %v1310_v61 = vpop.eup %1309 }
 0x312   : > { %v701_v60 = vmul.f32 1.442695, %v700_v59  ;;  %v482_v2 = vpack.c.bf16 %v1310_v61, %v1310_v61  ;;  %v479_v7 = vsel %vm425_vm2, %v1310_v61, 0.0 }
 0x313   : > { %v484_v62 = vpop.permute.xlu0 %483 }
 0x314   : > { %1313 = vpow2.f32 %v701_v60  ;;  %v490_v63 = vsel %vm488_vm4, %v484_v62, 0 }
 0x315   : > { %1160 = vmatpush3.bf16.msra.mxu0 %v490_v63 }
 0x316   : > { %1171 = vmatprep.subr.bf16.mxu0 %v1508_v0 }
 0x317   : > { %v819_v16 = vpop.permute.xlu0 %818 }
 0x318   : > { %1162 = vmatmul.mubr.msk.bf16.vlgmr.msra.gmra.mxu0 %vm425_vm2, %v482_v2  ;;  %v824_v18 = vsel %vm488_vm4, %v819_v16, 0 }
 0x319   : > { %v1312_v5 = vpop.eup %1311  ;;  %1172 = vmatpush3.bf16.msra.mxu0 %v602_v4  ;;  %1173 = vmatprep.mubr.msk.bf16.mxu0 %vm1509_vm0, %v1508_v0 }
 0x31a   : > { %v592_v6 = vsel %vm425_vm2, %v1312_v5, 0.0  ;;  %1183 = vmatprep.subr.bf16.mxu0 %v1508_v0  ;;  %v595_v8 = vpack.c.bf16 %v1312_v5, %v1312_v5 }
 0x31b   : > { %593 = vadd.xlane.f32.xlu1 %v592_v6 }
 0x31f   : > { %480 = vadd.xlane.f32.xlu1 %v479_v7 }
 0x320   : > { %1174 = vmatmul.mubr.msk.bf16.vlgmr.msra.gmra.mxu0 %vm425_vm2, %v595_v8 }
 0x321   : > { %v1314_v9 = vpop.eup %1313  ;;  %1185 = vmatprep.mubr.msk.bf16.mxu0 %vm1509_vm0, %v1508_v0 }
 0x322   : > { %v703_v10 = vsel %vm425_vm2, %v1314_v9, 0.0  ;;  %v706_v17 = vpack.c.bf16 %v1314_v9, %v1314_v9 }
 0x323   : > { %704 = vadd.xlane.f32.xlu0 %v703_v10 }
 0x334   : > { %v810_v11 = vpop.xlane.xlu1 %809 }
 0x335   : > { %v811_v12 = vsub.f32 %v807_v50, %v810_v11 }
 0x337   : > { %v812_v13 = vmul.f32 1.442695, %v811_v12  ;;  %v1119_v12 = vld [vmem:[#allocation7] ss:$0 sm:$0xff] }
 0x338   : > { %v708_v14 = vpop.permute.xlu1 %707 }
 0x339   : > { %1315 = vpow2.f32 %v812_v13  ;;  %v713_v15 = vsel %vm488_vm4, %v708_v14, 0  ;;  %v1120_v14 = vld [vmem:[#allocation9] ss:$0 sm:$0xff] }
 0x33a   : > { %1184 = vmatpush3.bf16.msra.mxu0 %v713_v15 }
 0x33b   : > { %1195 = vmatprep.subr.bf16.mxu0 %v1508_v0 }
 0x33d   : > { %1186 = vmatmul.mubr.msk.bf16.vlgmr.msra.gmra.mxu0 %vm425_vm2, %v706_v17 }
 0x33e   : > { %1196 = vmatpush3.bf16.msra.mxu0 %v824_v18  ;;  %1197 = vmatprep.mubr.msk.bf16.mxu0 %vm1509_vm0, %v1508_v0 }
 0x346   : > { %v1316_v19 = vpop.eup %1315 }
 0x347   : > { %v814_v20 = vsel %vm425_vm2, %v1316_v19, 0.0  ;;  %v817_v21 = vpack.c.bf16 %v1316_v19, %v1316_v19 }
 0x348   : > { %815 = vadd.xlane.f32.xlu0 %v814_v20 }
 0x349   : > { %1198 = vmatmul.mubr.msk.bf16.vlgmr.msra.gmra.mxu0 %vm425_vm2, %v817_v21 }
 0x3a4   : > { %v594_v22 = vpop.xlane.xlu1 %593 }
 0x3a5   : > { %1317 = vrcp.f32 %v594_v22 }
 0x3a8   : > { %v481_v48 = vpop.xlane.xlu1 %480 }
 0x3ac   : > { %v705_v33 = vpop.xlane.xlu0 %704 }
 0x3ad   : > { %1319 = vrcp.f32 %v705_v33 }
 0x3b2   : > { %v1318_v27 = vpop.eup %1317 }
 0x3ba   : > { %v1320_v36 = vpop.eup %1319 }
 0x3d1   : > { %v816_v35 = vpop.xlane.xlu0 %815 }
 0x3d2   : > { %1321 = vrcp.f32 %v816_v35 }
 0x3d3   : > { %1323 = vrcp.f32 %v481_v48 }
 0x3d8   : > { %v526_v23 = vpop.f32.mrf.mxu0 }
 0x3da   : > { %v1163_v24 = vpop.f32.mrf.mxu0 }
 0x3dc   : > { %v529_v25 = vpop.f32.mrf.mxu0 }
 0x3de   : > { %v1164_v26 = vpop.f32.mrf.mxu0 }
 0x3df   : > { %v1322_v43 = vpop.eup %1321 }
 0x3e0   : > { %v638_v28 = vpop.f32.mrf.mxu0  ;;  %v1324_v49 = vpop.eup %1323 }
 0x3e1   : > { %v645_v29 = vmul.f32 %v1318_v27, %v638_v28  ;;  %v533_v52 = vmul.f32 %v1324_v49, %v526_v23 }
 0x3e2   : > { %v1175_v30 = vpop.f32.mrf.mxu0 }
 0x3e3   : > { %869 = vrot.lane.b32.xlu0 %v645_v29, %s1521_s24 }
 0x3e4   : > { %v641_v31 = vpop.f32.mrf.mxu0 }
 0x3e6   : > { %v1176_v32 = vpop.f32.mrf.mxu0 }
 0x3fd   : > { %v749_v37 = vpop.f32.mrf.mxu0 }
 0x3fe   : > { %v756_v39 = vmul.f32 %v1320_v36, %v749_v37 }
 0x3ff   : > { %v1187_v40 = vpop.f32.mrf.mxu0 }
 0x400   : > { %873 = vrot.lane.b32.xlu1 %v756_v39, %s1522_s29 }
 0x401   : > { %v752_v41 = vpop.f32.mrf.mxu0 }
 0x403   : > { %v1188_v42 = vpop.f32.mrf.mxu0 }
 0x409   : > { %v860_v44 = vpop.f32.mrf.mxu0 }
 0x40a   : > { %v867_v45 = vmul.f32 %v1322_v43, %v860_v44 }
 0x40b   : > { %v1199_v46 = vpop.f32.mrf.mxu0 }
 0x40c   : > { %877 = vrot.lane.b32.xlu1 %v867_v45, %s1523_s9 }
 0x40d   : > { %v863_v0 = vpop.f32.mrf.mxu0 }
 0x40f   : > { %v1200_v47 = vpop.f32.mrf.mxu0 }
 0x455   : > { %v870_v50 = vpop.permute.xlu0 %869 }
 0x456   : > { %v880_v53 = vsel %vm425_vm2, %v533_v52, %v870_v50 }
 0x472   : > { %v874_v51 = vpop.permute.xlu1 %873 }
 0x473   : > { %v882_v54 = vsel %vm881_vm5, %v880_v53, %v874_v51 }
 0x47e   : > { %v878_v55 = vpop.permute.xlu1 %877 }
 0x47f   : > { %v884_v56 = vsel %vm883_vm6, %v882_v54, %v878_v55 }
 0x480   : > { %v885_v57 = vpack.c.bf16 %v884_v56, %v884_v56 }
 0x482   : > { %1206 = vmatmul.mubr.msk.bf16.vlgmr.msra.gmra.mxu1 %vm370_vm1, %v885_v57 }
 0x542   : > { %v946_v59 = vpop.f32.mrf.mxu1 }
 0x543   : > { %v947_v60 = vadd.f32 %v1115_v58, %v946_v59 }
 0x544   : > { %v1207_v61 = vpop.f32.mrf.mxu1 }
 0x545   : > { %v952_v62 = vadd.f32 %v947_v60, %v1728_v3 }
 0x546   : > { %v949_v63 = vpop.f32.mrf.mxu1 }
 0x547   : > { %v953_v1 = vsel %vm370_vm1, %v952_v62, 0.0 }
 0x548   : > { %954 = vadd.xlane.f32.xlu0 %v953_v1  ;;  %v1208_v2 = vpop.f32.mrf.mxu1 }
 0x5d1   : > { %v955_v4 = vpop.xlane.xlu0 %954 }
 0x5d2   : > { %v957_v5 = vmul.f32 0.03125, %v955_v4 }
 0x5d4   : > { %v958_v6 = vsub.f32 %v952_v62, %v957_v5 }
 0x5d6   : > { %v959_v7 = vmul.f32 %v958_v6, %v958_v6 }
 0x5d8   : > { %v960_v8 = vsel %vm370_vm1, %v959_v7, 0.0 }
 0x5d9   : > { %961 = vadd.xlane.f32.xlu1 %v960_v8 }
 0x662   : > { %v962_v9 = vpop.xlane.xlu1 %961 }
 0x663   : > { %v963_v10 = vmul.f32 0.03125, %v962_v9 }
 0x665   : > { %v964_v11 = vadd.f32 1e-05, %v963_v10 }
 0x667   : > { %1325 = vrsqrt.f32 %v964_v11 }
 0x674   : > { %v1326_v3 = vpop.eup %1325 }
 0x675   : > { %v966_v13 = vmul.f32 %v1326_v3, %v958_v6 }
 0x677   : > { %v974_v15 = vmul.f32 %v1119_v12, %v966_v13 }
 0x679   : > { %v982_v16 = vadd.f32 %v1120_v14, %v974_v15 }
 0x67b   : > { %983 = vst.msk [vmem:[%s343_s17] sm:$0xff] %vm370_vm1, %v982_v16 }
 0x67c PF: > { %p19_p2 = scmp.ge.s32.totalorder %s1656_s12, 4   ;;  %s1848_s24 = smov %s1493_s25 }
 0x67d   : > { %s1849_s25 = smov %s1497_s26  ;;  %s1850_s26 = smov %s1668_s19 }
 0x67e   : > { %s1851_s27 = smov %s1656_s12  ;;  %21 = sbr.rel (!%p19_p2) target bundleno = 5 (0x5), region = 104 }
 0x683   :  { %1003 = vsyncpa [#allocation3], 1 }
 0x684   :  { %1005 = vsyncpa [#allocation3 + $0x1], 1 }
 0x685   :  { %1006 = vsyncpa [#allocation5], 1 }
 0x686   :  { %1007 = vsyncpa [#allocation8], 1 }

// kernel: decoder_forward.3
= control target key start
LH: loop header
LB: loop body
LE: loop exit
PB: predicated region body
PF: predicated region fallthrough
CT: control target
= control target key end

     0   :  { %s2144_s0 = inlined_call_operand.vmem [shape: f32[2,8,32], index: 0, kind: input, shape index: {}]   ;;  %s2145_s1 = inlined_call_operand.vmem [shape: f32[2,8,32], index: 1, kind: input, shape index: {}]   ;;  %s2146_s2 = inlined_call_operand.vmem [shape: bf16[32,32], index: 2, kind: input, shape index: {}]   ;;  %s2147_s3 = inlined_call_operand.vmem [shape: f32[1,32], index: 3, kind: input, shape index: {}]   ;;  %s2148_s4 = inlined_call_operand.vmem [shape: bf16[32,64], index: 4, kind: input, shape index: {}]   ;;  %s2149_s5 = inlined_call_operand.vmem [shape: f32[1,64], index: 5, kind: input, shape index: {}]   ;;  %s2150_s6 = inlined_call_operand.vmem [shape: bf16[32,32], index: 6, kind: input, shape index: {}]   ;;  %s2151_s7 = inlined_call_operand.vmem [shape: f32[1,32], index: 7, kind: input, shape index: {}]   ;;  %s2152_s8 = inlined_call_operand.vmem [shape: f32[1,32], index: 8, kind: input, shape index: {}]   ;;  %s2153_s9 = inlined_call_operand.vmem [shape: f32[1,32], index: 9, kind: input, shape index: {}]   ;;  %s2154_s10 = inlined_call_operand.vmem [shape: bf16[32,128], index: 10, kind: input, shape index: {}]   ;;  %s2155_s11 = inlined_call_operand.vmem [shape: f32[1,128], index: 11, kind: input, shape index: {}]   ;;  %s2156_s12 = inlined_call_operand.vmem [shape: bf16[128,32], index: 12, kind: input, shape index: {}]   ;;  %s2157_s13 = inlined_call_operand.vmem [shape: f32[1,32], index: 13, kind: input, shape index: {}]   ;;  %s2158_s14 = inlined_call_operand.hbm [shape: f32[2,8,32], index: 14, kind: output, shape index: {}]  }
   0x1   :  { %2160 = sst [smem:[#allocation7_spill]] %s2144_s0 }
   0x2   :  { %2161 = sst [smem:[#allocation8_spill]] %s2146_s2 }
   0x3   :  { %19 = vsyncpa [#allocation3], 0 }
   0x4   :  { %21 = vsyncpa [#allocation3 + $0x1], 0  ;;  %s1871_s29 = smov 0   ;;  %s1873_s30 = smov 0  }
   0x5   :  { %s1875_s15 = smov 0   ;;  %s1877_s16 = smov 0  }
   0x6 LB: > { %2162 = sst [smem:[#allocation5_spill]] %s1777_s15  ;;  %s1892_s17 = sadd.s32 4294967295, %s1781_s16   ;;  %s1781_s16 = sphi %s1877_s16, %s2172_s16   ;;  %s1777_s15 = sphi %s1875_s15, %s2169_s15   ;;  %s1773_s30 = sphi %s1873_s30, %s2171_s30   ;;  %s1769_s29 = sphi %s1871_s29, %s2170_s29  }
   0x7   : > { %s1451_s18 = sadd.s32 4294967294, %s1781_s16   ;;  %s1896_s19 = sadd.s32 1, %s1781_s16  }
   0x8   : > { %s338_s20 = sadd.s32 1, %s1777_s15  ;;  %s335_s21 = ssub.s32 %s1781_s16, %s1896_s19 }
   0x9   : > { %p348_p0 = scmp.ne.s32.totalorder %s1777_s15, %s1773_s30  ;;  %p336_p1 = scmp.eq.s32.totalorder %s335_s21, 0 }
   0xa   : > { %p349_p2 = scmp.eq.s32.totalorder %s1892_s17, 1  ;;  %p354_p3 = scmp.ne.s32.totalorder %s1773_s30, %s1769_s29 }
   0xb   : > { %p355_p4 = scmp.eq.s32.totalorder %s1451_s18, 1  ;;  %p1454_p7 = scmp.ge.s32.totalorder %s1781_s16, 1 }
   0xc   : > { %s1907_s22 = scalar_select %p336_p1, %s1777_s15, %s338_s20  }
   0xd   : > { %p1909_p5 = por %p349_p2, %p348_p0  ;;  %p1913_p6 = por %p355_p4, %p354_p3 }
   0xe   : > { %2163 = sst [smem:[#allocation6_spill]] %s1907_s22  ;;  %p423_p8 = scmp.lt.s32.totalorder %s1781_s16, 3 }
  0x10   : > { %p424_p9 = pnand %p1454_p7, %p423_p8 }
  0x11   : > { %s2166_s2 = sld [smem:[#allocation8_spill]] (!%p424_p9)  ;;  %p472_p10 = scmp.lt.s32.totalorder (!%p424_p9), %s1892_s17, 1 }
  0x12   : > { %427 = sbr.rel (%p424_p9) target bundleno = 1990 (0x7c6), region = 76  ;;  %s2167_s0 = sld [smem:[#allocation7_spill]] (!%p424_p9) }
  0x13   : > { %s1785_s25 = smov (!%p424_p9), 112   ;;  %s1787_s27 = smov (!%p424_p9), 104  }
  0x14   : > { %s1790_s21 = smov (!%p424_p9), 72  }
  0x17   : > { %v1685_v0 = vld [vmem:[%s2166_s2 + $0x8] sm:$0xff]   ;;  %v1783_v1 = vmov 0.0   ;;  %v1686_v2 = vld [vmem:[%s2166_s2] sm:$0xff]   ;;  %vm1784_vm0 = vmmov 0   ;;  %s473_s18 = scalar_select %p472_p10, %s1892_s17, 1  ;;  %vm507_vm1 = vcmask 261120  }
  0x18   : > { %1534 = vmatprep.subr.bf16.mxu1 %v1783_v1  ;;  %1562 = vmatprep.subr.bf16.mxu0 %v1783_v1  ;;  %v1687_v4 = vld [vmem:[%s2148_s4 + $0x8] sm:$0xff]   ;;  %v1688_v7 = vld [vmem:[%s2148_s4] sm:$0xff]   ;;  %vm621_vm2 = vcmask 64512   ;;  %vm684_vm3 = vcmask 1043456   ;;  %s1791_s2 = smov 88   ;;  %vm1074_vm4 = vcmask 130048  }
  0x19   : > { %1535 = vmatpush3.bf16.msra.mxu1 %v1685_v0  ;;  %1538 = vmatprep.mubr.msk.bf16.mxu1 %vm1784_vm0, %v1783_v1  ;;  %s1456_s20 = sshll.u32 %s473_s18, 3  ;;  %v1458_v11 = vld [vmem:[%s2147_s3] ss:$0 sm:$0xff]  ;;  %s1789_s18 = smov 80   ;;  %vm1076_vm5 = vcmask 195584  }
  0x1a   : > { %1536 = vmatprep.subr.bf16.mxu1 %v1783_v1  ;;  %1564 = vmatprep.mubr.msk.bf16.mxu0 %vm1784_vm0, %v1783_v1  ;;  %s475_s26 = scalar_lea.vmem %s2167_s0, %s1456_s20  ;;  %s479_s28 = scalar_lea.vmem %s2145_s1, %s1456_s20  ;;  %v1462_v14 = vld [vmem:[%s2149_s5] ss:$0 sm:$0xff] }
  0x1b   : > { %v1941_v3 = vld [vmem:[%s475_s26] sm:$0xff]  ;;  %s1786_s26 = smov 120   ;;  %s1792_s20 = smov 8  }
  0x1c   : > { %v483_v5 = vpack.c.bf16 %v1941_v3, %v1941_v3  ;;  %v482_v6 = vld [vmem:[%s479_s28] sm:$0xff]  ;;  %s1788_s28 = smov 96  }
  0x1d   : > { %1537 = vmatpush3.bf16.msra.mxu1 %v1686_v2  ;;  %v551_v8 = vpack.c.bf16 %v482_v6, %v482_v6 }
  0x1e   : > { %1542 = vmatprep.subr.bf16.mxu1 %v1783_v1 }
  0x20   : > { %1539 = vmatmul.mubr.msk.bf16.vlgmr.msra.gmra.mxu1 %vm507_vm1, %v483_v5 }
  0x21   : > { %1543 = vmatpush3.bf16.msra.mxu1 %v1687_v4  ;;  %1546 = vmatprep.mubr.msk.bf16.mxu1 %vm1784_vm0, %v1783_v1 }
  0x22   : > { %1544 = vmatprep.subr.bf16.mxu1 %v1783_v1 }
  0x25   : > { %1545 = vmatpush3.bf16.msra.mxu1 %v1688_v7 }
  0x26   : > { %1550 = vmatprep.subr.bf16.mxu1 %v1783_v1 }
  0x28   : > { %1547 = vmatmul.mubr.msk.bf16.vlgmr.msra.gmra.mxu1 %vm507_vm1, %v551_v8 }
  0x29   : > { %1552 = vmatprep.mubr.msk.bf16.mxu1 %vm1784_vm0, %v1783_v1 }
  0xe0   : > { %v545_v9 = vpop.f32.mrf.mxu1 }
  0xe1   : > { %v546_v15 = vadd.f32 %v1458_v11, %v545_v9 }
  0xe2   : > { %v1540_v10 = vpop.f32.mrf.mxu1 }
  0xe3   : > { %v618_v19 = vmul.f32 0.35355338, %v546_v15 }
  0xe4   : > { %v548_v12 = vpop.f32.mrf.mxu1 }
  0xe5   : > { %v619_v24 = vpack.c.bf16 %v618_v19, %v618_v19 }
  0xe6   : > { %v1541_v13 = vpop.f32.mrf.mxu1 }
  0xe8   : > { %v612_v16 = vpop.f32.mrf.mxu1 }
  0xe9   : > { %v613_v17 = vadd.f32 %v1462_v14, %v612_v16 }
  0xea   : > { %v1548_v18 = vpop.f32.mrf.mxu1 }
  0xeb   : > { %v1965_v20 = vpack.c.bf16 %v613_v17, %v613_v17 }
  0xec   : > { %v615_v21 = vpop.f32.mrf.mxu1 }
  0xed   : > { %843 = vrot.lane.b32.xlu1 %v1965_v20, %s1785_s25  ;;  %733 = vrot.lane.b32.xlu0 %v1965_v20, %s1786_s26  ;;  %v626_v22 = vsel %vm621_vm2, %v1965_v20, 0 }
  0xee   : > { %v1549_v23 = vpop.f32.mrf.mxu1  ;;  %1551 = vmatpush3.bf16.xpose.msra.mxu1 %v626_v22 }
  0xef   : > { %1556 = vmatprep.subr.bf16.mxu1 %v1783_v1 }
  0xf1   : > { %841 = vrot.lane.b32.xlu1 %v619_v24, %s1785_s25  ;;  %731 = vrot.lane.b32.xlu0 %v619_v24, %s1786_s26 }
  0xf5   : > { %951 = vrot.lane.b32.xlu1 %v619_v24, %s1787_s27  ;;  %953 = vrot.lane.b32.xlu0 %v1965_v20, %s1787_s27  ;;  %s1793_s27 = smov 16  }
  0xf6   : > { %1553 = vmatmul.mubr.msk.bf16.vlgmr.msra.gmra.mxu1 %vm621_vm2, %v619_v24 }
  0xf7   : > { %1558 = vmatprep.mubr.msk.bf16.mxu1 %vm1784_vm0, %v1783_v1 }
  0xf9   : > { %679 = vrot.lane.b32.xlu1 %v1965_v20, %s1788_s28  ;;  %s1794_s28 = smov 24  }
 0x15f   : > { %v844_v25 = vpop.permute.xlu1 %843  ;;  %v734_v26 = vpop.permute.xlu0 %733 }
 0x160   : > { %v739_v27 = vsel %vm621_vm2, %v734_v26, 0  ;;  %v849_v31 = vsel %vm621_vm2, %v844_v25, 0 }
 0x161   : > { %1563 = vmatpush3.bf16.xpose.msra.mxu0 %v739_v27 }
 0x162   : > { %1574 = vmatprep.subr.bf16.mxu0 %v1783_v1 }
 0x163   : > { %v842_v28 = vpop.permute.xlu1 %841  ;;  %v732_v29 = vpop.permute.xlu0 %731 }
 0x167   : > { %v952_v30 = vpop.permute.xlu1 %951  ;;  %v954_v34 = vpop.permute.xlu0 %953 }
 0x168   : > { %1565 = vmatmul.mubr.msk.bf16.vlgmr.msra.gmra.mxu0 %vm621_vm2, %v732_v29  ;;  %v959_v35 = vsel %vm621_vm2, %v954_v34, 0 }
 0x169   : > { %1575 = vmatpush3.bf16.xpose.msra.mxu0 %v849_v31  ;;  %1576 = vmatprep.mubr.msk.bf16.mxu0 %vm1784_vm0, %v1783_v1 }
 0x16a   : > { %1586 = vmatprep.subr.bf16.mxu0 %v1783_v1 }
 0x16b   : > { %v680_v32 = vpop.permute.xlu1 %679 }
 0x16c   : > { %v686_v33 = vsel %vm684_vm3, %v680_v32, 0 }
 0x16d   : > { %1557 = vmatpush3.bf16.msra.mxu1 %v686_v33 }
 0x16e   : > { %1568 = vmatprep.subr.bf16.mxu1 %v1783_v1 }
 0x170   : > { %1577 = vmatmul.mubr.msk.bf16.vlgmr.msra.gmra.mxu0 %vm621_vm2, %v842_v28 }
 0x171   : > { %1587 = vmatpush3.bf16.xpose.msra.mxu0 %v959_v35  ;;  %1588 = vmatprep.mubr.msk.bf16.mxu0 %vm1784_vm0, %v1783_v1 }
 0x172   : > { %1598 = vmatprep.subr.bf16.mxu0 %v1783_v1 }
 0x178   : > { %1589 = vmatmul.mubr.msk.bf16.vlgmr.msra.gmra.mxu0 %vm621_vm2, %v952_v30  ;;  %v1689_v30 = vld [vmem:[%s2150_s6 + $0x8] sm:$0xff]  }
 0x179   : > { %1602 = vmatprep.mubr.msk.bf16.mxu0 %vm1784_vm0, %v1783_v1  ;;  %1599 = vmatpush3.bf16.msra.mxu0 %v1689_v30  ;;  %v1700_v30 = vld [vmem:[%s2156_s12] sm:$0xff]  }
 0x17a   : > { %1600 = vmatprep.subr.bf16.mxu0 %v1783_v1 }
 0x1b6   : > { %v662_v36 = vpop.f32.mrf.mxu1 }
 0x1b7   : > { %v668_v37 = vsel %vm621_vm2, %v662_v36, -inf }
 0x1b8   : > { %669 = vmax.xlane.f32.xlu0 %v668_v37  ;;  %v1554_v38 = vpop.f32.mrf.mxu1  ;;  %v1690_v37 = vld [vmem:[%s2150_s6] sm:$0xff]  }
 0x1b9   : > { %1601 = vmatpush3.bf16.msra.mxu0 %v1690_v37 }
 0x1ba   : > { %v665_v39 = vpop.f32.mrf.mxu1  ;;  %1614 = vmatprep.subr.bf16.mxu0 %v1783_v1 }
 0x1bc   : > { %v1555_v40 = vpop.f32.mrf.mxu1 }
 0x228   : > { %v775_v41 = vpop.f32.mrf.mxu0 }
 0x229   : > { %v781_v42 = vsel %vm621_vm2, %v775_v41, -inf }
 0x22a   : > { %782 = vmax.xlane.f32.xlu1 %v781_v42  ;;  %v1566_v43 = vpop.f32.mrf.mxu0 }
 0x22c   : > { %v778_v44 = vpop.f32.mrf.mxu0 }
 0x22e   : > { %v1567_v45 = vpop.f32.mrf.mxu0 }
 0x230   : > { %v885_v46 = vpop.f32.mrf.mxu0 }
 0x231   : > { %v891_v47 = vsel %vm621_vm2, %v885_v46, -inf }
 0x232   : > { %v1578_v48 = vpop.f32.mrf.mxu0  ;;  %892 = vmax.xlane.f32.xlu0 %v891_v47 }
 0x234   : > { %v888_v49 = vpop.f32.mrf.mxu0 }
 0x236   : > { %v1579_v50 = vpop.f32.mrf.mxu0 }
 0x238   : > { %v995_v51 = vpop.f32.mrf.mxu0 }
 0x239   : > { %v1001_v52 = vsel %vm621_vm2, %v995_v51, -inf }
 0x23a   : > { %v1590_v53 = vpop.f32.mrf.mxu0  ;;  %1002 = vmax.xlane.f32.xlu0 %v1001_v52 }
 0x23b   : > { %901 = vrot.lane.b32.xlu1 %v1965_v20, %s1789_s18  ;;  %s1795_s18 = smov [#allocation2]  }
 0x23c   : > { %v998_v54 = vpop.f32.mrf.mxu0 }
 0x23e   : > { %v1591_v55 = vpop.f32.mrf.mxu0 }
 0x23f   : > { %1011 = vrot.lane.b32.xlu1 %v1965_v20, %s1790_s21  ;;  %s1725_s21 = sshll.u32 %s1795_s18, 4  ;;  %s1726_s21 = int_to_ptr.vmem [resolvable:$false] %s1725_s21 }
 0x241   : > { %v670_v56 = vpop.xlane.xlu0 %669 }
 0x242   : > { %v671_v57 = vsub.f32 %v662_v36, %v670_v56 }
 0x244   : > { %v672_v58 = vmul.f32 1.442695, %v671_v57 }
 0x246   : > { %1701 = vpow2.f32 %v672_v58 }
 0x250   : > { %791 = vrot.lane.b32.xlu0 %v1965_v20, %s1791_s2  ;;  %s1494_s2 = sshll.u32 %s1892_s17, 7 }
 0x251   : > { %s2102_s26 = scalar_lea.hbm %s2158_s14, %s1494_s2  ;;  %s1727_s2 = scalar_lea.vmem %s1726_s21, 256 }
 0x253   : > { %v1702_v59 = vpop.eup %1701 }
 0x254   : > { %v677_v60 = vpack.c.bf16 %v1702_v59, %v1702_v59  ;;  %v674_v22 = vsel %vm621_vm2, %v1702_v59, 0.0 }
 0x256   : > { %1559 = vmatmul.mubr.msk.bf16.vlgmr.msra.gmra.mxu1 %vm621_vm2, %v677_v60 }
 0x257   : > { %1570 = vmatprep.mubr.msk.bf16.mxu1 %vm1784_vm0, %v1783_v1 }
 0x2b3   : > { %v783_v61 = vpop.xlane.xlu1 %782 }
 0x2b4   : > { %v784_v62 = vsub.f32 %v775_v41, %v783_v61  ;;  %v1474_v61 = vld [vmem:[%s2151_s7] ss:$0 sm:$0xff] }
 0x2b6   : > { %v785_v63 = vmul.f32 1.442695, %v784_v62 }
 0x2b7   : > { %v902_v12 = vpop.permute.xlu1 %901 }
 0x2b8   : > { %1703 = vpow2.f32 %v785_v63  ;;  %v907_v14 = vsel %vm684_vm3, %v902_v12, 0  ;;  %v1691_v12 = vld [vmem:[%s2154_s10 + $0x8] sm:$0xff]  }
 0x2bb   : > { %v893_v0 = vpop.xlane.xlu0 %892  ;;  %v1012_v17 = vpop.permute.xlu1 %1011 }
 0x2bc   : > { %v894_v2 = vsub.f32 %v885_v46, %v893_v0  ;;  %v1017_v19 = vsel %vm684_vm3, %v1012_v17, 0  ;;  %v1478_v17 = vld [vmem:[%s2152_s8] ss:$0 sm:$0xff] }
 0x2be   : > { %v895_v4 = vmul.f32 1.442695, %v894_v2 }
 0x2c0   : > { %1705 = vpow2.f32 %v895_v4 }
 0x2c3   : > { %v1003_v5 = vpop.xlane.xlu0 %1002 }
 0x2c4   : > { %v1004_v6 = vsub.f32 %v995_v51, %v1003_v5 }
 0x2c5   : > { %v1704_v7 = vpop.eup %1703 }
 0x2c6   : > { %v1005_v8 = vmul.f32 1.442695, %v1004_v6  ;;  %v787_v9 = vsel %vm621_vm2, %v1704_v7, 0.0  ;;  %v790_v13 = vpack.c.bf16 %v1704_v7, %v1704_v7 }
 0x2c7   : > { %788 = vadd.xlane.f32.xlu0 %v787_v9  ;;  %v792_v10 = vpop.permute.xlu0 %791 }
 0x2c8   : > { %1707 = vpow2.f32 %v1005_v8  ;;  %v797_v11 = vsel %vm684_vm3, %v792_v10, 0 }
 0x2c9   : > { %1569 = vmatpush3.bf16.msra.mxu1 %v797_v11 }
 0x2ca   : > { %1580 = vmatprep.subr.bf16.mxu1 %v1783_v1 }
 0x2cc   : > { %1571 = vmatmul.mubr.msk.bf16.vlgmr.msra.gmra.mxu1 %vm621_vm2, %v790_v13 }
 0x2cd   : > { %v1706_v15 = vpop.eup %1705  ;;  %1581 = vmatpush3.bf16.msra.mxu1 %v907_v14  ;;  %1582 = vmatprep.mubr.msk.bf16.mxu1 %vm1784_vm0, %v1783_v1 }
 0x2ce   : > { %v897_v16 = vsel %vm621_vm2, %v1706_v15, 0.0  ;;  %1592 = vmatprep.subr.bf16.mxu1 %v1783_v1  ;;  %v900_v18 = vpack.c.bf16 %v1706_v15, %v1706_v15 }
 0x2cf   : > { %898 = vadd.xlane.f32.xlu1 %v897_v16 }
 0x2d4   : > { %1583 = vmatmul.mubr.msk.bf16.vlgmr.msra.gmra.mxu1 %vm621_vm2, %v900_v18 }
 0x2d5   : > { %v1708_v20 = vpop.eup %1707  ;;  %1593 = vmatpush3.bf16.msra.mxu1 %v1017_v19  ;;  %1594 = vmatprep.mubr.msk.bf16.mxu1 %vm1784_vm0, %v1783_v1  ;;  %v1479_v19 = vld [vmem:[%s2153_s9] ss:$0 sm:$0xff] }
 0x2d6   : > { %v1007_v21 = vsel %vm621_vm2, %v1708_v20, 0.0  ;;  %1606 = vmatprep.subr.bf16.mxu1 %v1783_v1  ;;  %v1010_v23 = vpack.c.bf16 %v1708_v20, %v1708_v20 }
 0x2d7   : > { %1008 = vadd.xlane.f32.xlu0 %v1007_v21 }
 0x2db   : > { %675 = vadd.xlane.f32.xlu0 %v674_v22 }
 0x2dc   : > { %1595 = vmatmul.mubr.msk.bf16.vlgmr.msra.gmra.mxu1 %vm621_vm2, %v1010_v23  ;;  %v1693_v23 = vld [vmem:[%s2156_s12 + $0x38] sm:$0xff]  }
 0x2dd   : > { %1610 = vmatprep.mubr.msk.bf16.mxu1 %vm1784_vm0, %v1783_v1  ;;  %1607 = vmatpush3.bf16.msra.mxu1 %v1691_v12 }
 0x2de   : > { %1608 = vmatprep.subr.bf16.mxu1 %v1783_v1 }
 0x316   : > { %v722_v24 = vpop.f32.mrf.mxu1 }
 0x318   : > { %v1560_v25 = vpop.f32.mrf.mxu1 }
 0x319   : > { %v1695_v25 = vld [vmem:[%s2156_s12 + $0x28] sm:$0xff]  }
 0x31a   : > { %v725_v26 = vpop.f32.mrf.mxu1 }
 0x31b   : > { %v1696_v26 = vld [vmem:[%s2156_s12 + $0x20] sm:$0xff]  }
 0x31c   : > { %v1561_v27 = vpop.f32.mrf.mxu1 }
 0x31d   : > { %v1697_v27 = vld [vmem:[%s2156_s12 + $0x18] sm:$0xff]  }
 0x350   : > { %v789_v28 = vpop.xlane.xlu0 %788 }
 0x351   : > { %1709 = vrcp.f32 %v789_v28  ;;  %v1698_v28 = vld [vmem:[%s2156_s12 + $0x10] sm:$0xff]  }
 0x358   : > { %v899_v29 = vpop.xlane.xlu1 %898 }
 0x359   : > { %1711 = vrcp.f32 %v899_v29  ;;  %v1699_v29 = vld [vmem:[%s2156_s12 + $0x8] sm:$0xff]  }
 0x35e   : > { %v1710_v31 = vpop.eup %1709 }
 0x360   : > { %v1009_v32 = vpop.xlane.xlu0 %1008 }
 0x361   : > { %1713 = vrcp.f32 %v1009_v32 }
 0x364   : > { %v676_v51 = vpop.xlane.xlu0 %675 }
 0x365   : > { %1715 = vrcp.f32 %v676_v51 }
 0x366   : > { %v1712_v39 = vpop.eup %1711 }
 0x36e   : > { %v1714_v45 = vpop.eup %1713 }
 0x372   : > { %v1716_v52 = vpop.eup %1715 }
 0x373   : > { %v729_v54 = vmul.f32 %v1716_v52, %v722_v24  ;;  %v1694_v24 = vld [vmem:[%s2156_s12 + $0x30] sm:$0xff]  }
 0x38c   : > { %v833_v33 = vpop.f32.mrf.mxu1 }
 0x38d   : > { %v840_v34 = vmul.f32 %v1710_v31, %v833_v33  ;;  %v1480_v31 = vld [vmem:[%s2155_s11] ss:$0 sm:$0xff] }
 0x38e   : > { %v1572_v35 = vpop.f32.mrf.mxu1 }
 0x38f   : > { %1062 = vrot.lane.b32.xlu1 %v840_v34, %s1792_s20 }
 0x390   : > { %v836_v36 = vpop.f32.mrf.mxu1 }
 0x392   : > { %v1573_v38 = vpop.f32.mrf.mxu1 }
 0x394   : > { %v943_v40 = vpop.f32.mrf.mxu1 }
 0x395   : > { %v950_v41 = vmul.f32 %v1712_v39, %v943_v40 }
 0x396   : > { %v1584_v42 = vpop.f32.mrf.mxu1 }
 0x397   : > { %1066 = vrot.lane.b32.xlu0 %v950_v41, %s1793_s27  ;;  %s469_s27 = sand.u32 1, %s1773_s30  }
 0x398   : > { %v946_v43 = vpop.f32.mrf.mxu1  ;;  %s1367_s17 = scalar_lea.sflag [#allocation3], %s469_s27 }
 0x39a   : > { %v1585_v44 = vpop.f32.mrf.mxu1 }
 0x39c   : > { %v1053_v46 = vpop.f32.mrf.mxu1 }
 0x39d   : > { %v1060_v47 = vmul.f32 %v1714_v45, %v1053_v46  ;;  %v1484_v46 = vld [vmem:[%s2157_s13] ss:$0 sm:$0xff] }
 0x39e   : > { %v1596_v48 = vpop.f32.mrf.mxu1 }
 0x39f   : > { %1070 = vrot.lane.b32.xlu1 %v1060_v47, %s1794_s28  ;;  %s1455_s28 = sshll.u32 %s469_s27, 3 }
 0x3a0   : > { %v1056_v49 = vpop.f32.mrf.mxu1  ;;  %s471_s15 = scalar_lea.vmem [#allocation2], %s1455_s28 }
 0x3a1   : > { %s1380_s22 = sshll.u32 %s471_s15, 4  ;;  %s2104_s22 = int_to_ptr.vmem [resolvable:$true] %s1380_s22 }
 0x3a2   : > { %v1597_v50 = vpop.f32.mrf.mxu1  ;;  %s1721_s28 = scalar_lea.vmem %s2104_s22, 128  ;;  %p1728_p0 = scmp.lt.s32.totalorder %s2104_s22, %s1726_s21 }
 0x3a3   : > { %p1722_p11 = scmp.ne.s32.totalorder %s2104_s22, %s1721_s28  ;;  %p1729_p1 = scmp.lt.s32.totalorder %s1727_s2, %s1721_s28 }
 0x3a5   : > { %p1723_p12 = pnand %p1722_p11, %p1909_p5  ;;  %p1730_p2 = por %p1729_p1, %p1728_p0 }
 0x3a7   : > { %p1724_p13 = pneg %p1723_p12 }
 0x3a9   : > { %p1731_p3 = pnand %p1730_p2, %p1724_p13 }
 0x401   : > { %v1063_v53 = vpop.permute.xlu1 %1062 }
 0x402   : > { %v1073_v56 = vsel %vm621_vm2, %v729_v54, %v1063_v53 }
 0x409   : > { %v1067_v55 = vpop.permute.xlu0 %1066 }
 0x40a   : > { %v1075_v57 = vsel %vm1074_vm4, %v1073_v56, %v1067_v55 }
 0x411   : > { %v1071_v58 = vpop.permute.xlu1 %1070 }
 0x412   : > { %v1077_v59 = vsel %vm1076_vm5, %v1075_v57, %v1071_v58 }
 0x413   : > { %v1078_v60 = vpack.c.bf16 %v1077_v59, %v1077_v59 }
 0x415   : > { %1603 = vmatmul.mubr.msk.bf16.vlgmr.msra.gmra.mxu0 %vm507_vm1, %v1078_v60 }
 0x416   : > { %1630 = vmatprep.mubr.msk.bf16.mxu0 %vm1784_vm0, %v1783_v1  ;;  %1615 = vmatpush3.bf16.msra.mxu0 %v1693_v23 }
 0x417   : > { %1616 = vmatprep.subr.bf16.mxu0 %v1783_v1 }
 0x41a   : > { %1617 = vmatpush3.bf16.msra.mxu0 %v1694_v24 }
 0x41b   : > { %1618 = vmatprep.subr.bf16.mxu0 %v1783_v1 }
 0x41e   : > { %1619 = vmatpush3.bf16.msra.mxu0 %v1695_v25 }
 0x41f   : > { %1620 = vmatprep.subr.bf16.mxu0 %v1783_v1 }
 0x422   : > { %1621 = vmatpush3.bf16.msra.mxu0 %v1696_v26 }
 0x423   : > { %1622 = vmatprep.subr.bf16.mxu0 %v1783_v1 }
 0x426   : > { %1623 = vmatpush3.bf16.msra.mxu0 %v1697_v27 }
 0x427   : > { %1624 = vmatprep.subr.bf16.mxu0 %v1783_v1 }
 0x42a   : > { %1625 = vmatpush3.bf16.msra.mxu0 %v1698_v28 }
 0x42b   : > { %1626 = vmatprep.subr.bf16.mxu0 %v1783_v1 }
 0x42e   : > { %1627 = vmatpush3.bf16.msra.mxu0 %v1699_v29 }
 0x42f   : > { %1628 = vmatprep.subr.bf16.mxu0 %v1783_v1 }
 0x432   : > { %1629 = vmatpush3.bf16.msra.mxu0 %v1700_v30 }
 0x4d5   : > { %v1139_v62 = vpop.f32.mrf.mxu0 }
 0x4d6   : > { %v1140_v63 = vadd.f32 %v1474_v61, %v1139_v62 }
 0x4d7   : > { %v1604_v0 = vpop.f32.mrf.mxu0 }
 0x4d8   : > { %v2039_v2 = vadd.f32 %v1140_v63, %v1941_v3  ;;  %v1692_v3 = vld [vmem:[%s2154_s10] sm:$0xff]  }
 0x4d9   : > { %v1142_v4 = vpop.f32.mrf.mxu0  ;;  %1609 = vmatpush3.bf16.msra.mxu1 %v1692_v3 }
 0x4da   : > { %v1146_v5 = vsel %vm507_vm1, %v2039_v2, 0.0 }
 0x4db   : > { %1147 = vadd.xlane.f32.xlu1 %v1146_v5  ;;  %v1605_v6 = vpop.f32.mrf.mxu0 }
 0x564   : > { %v1148_v7 = vpop.xlane.xlu1 %1147 }
 0x565   : > { %v1150_v8 = vmul.f32 0.03125, %v1148_v7 }
 0x567   : > { %v1151_v9 = vsub.f32 %v2039_v2, %v1150_v8 }
 0x569   : > { %v1152_v10 = vmul.f32 %v1151_v9, %v1151_v9 }
 0x56b   : > { %v1153_v11 = vsel %vm507_vm1, %v1152_v10, 0.0 }
 0x56c   : > { %1154 = vadd.xlane.f32.xlu0 %v1153_v11 }
 0x5f5   : > { %v1155_v13 = vpop.xlane.xlu0 %1154 }
 0x5f6   : > { %v1156_v14 = vmul.f32 0.03125, %v1155_v13 }
 0x5f8   : > { %v1157_v15 = vadd.f32 1e-05, %v1156_v14 }
 0x5fa   : > { %1717 = vrsqrt.f32 %v1157_v15 }
 0x607   : > { %v1718_v16 = vpop.eup %1717 }
 0x608   : > { %v1159_v18 = vmul.f32 %v1718_v16, %v1151_v9 }
 0x60a   : > { %v1167_v20 = vmul.f32 %v1478_v17, %v1159_v18 }
 0x60c   : > { %v1175_v21 = vadd.f32 %v1479_v19, %v1167_v20 }
 0x60e   : > { %v1176_v22 = vpack.c.bf16 %v1175_v21, %v1175_v21 }
 0x610   : > { %1611 = vmatmul.mubr.msk.bf16.vlgmr.msra.gmra.mxu1 %vm507_vm1, %v1176_v22 }
 0x6d0   : > { %v1237_v32 = vpop.f32.mrf.mxu1 }
 0x6d1   : > { %v1238_v33 = vadd.f32 %v1480_v31, %v1237_v32 }
 0x6d2   : > { %v1612_v34 = vpop.f32.mrf.mxu1 }
 0x6d3   : > { %v1243_v35 = vmul.f32 %v1238_v33, %v1238_v33 }
 0x6d4   : > { %v1240_v36 = vpop.f32.mrf.mxu1 }
 0x6d5   : > { %v1244_v37 = vmul.f32 %v1243_v35, %v1238_v33 }
 0x6d6   : > { %v1613_v38 = vpop.f32.mrf.mxu1 }
 0x6d7   : > { %v1245_v39 = vmul.f32 0.044715, %v1244_v37 }
 0x6d9   : > { %v1246_v40 = vadd.f32 %v1245_v39, %v1238_v33 }
 0x6db   : > { %v1247_v41 = vmul.f32 0.7978846, %v1246_v40 }
 0x6dd   : > { %1719 = vtanh.f32 %v1247_v41 }
 0x6ea   : > { %v1720_v42 = vpop.eup %1719 }
 0x6eb   : > { %v1249_v1 = vadd.f32 1.0, %v1720_v42 }
 0x6ed   : > { %v1250_v43 = vmul.f32 0.5, %v1249_v1 }
 0x6ef   : > { %v1251_v44 = vmul.f32 %v1250_v43, %v1238_v33 }
 0x6f1   : > { %v1252_v45 = vpack.c.bf16 %v1251_v44, %v1251_v44 }
 0x6f3   : > { %1631 = vmatmul.mubr.bf16.vlgmr.msra.gmra.mxu0 %v1252_v45 }
 0x7b3   : > { %v1358_v47 = vpop.f32.mrf.mxu0 }
 0x7b4   : > { %v1359_v48 = vadd.f32 %v1484_v46, %v1358_v47 }
 0x7b5   : > { %v1632_v49 = vpop.f32.mrf.mxu0 }
 0x7b6   : > { %v1364_v50 = vadd.f32 %v1359_v48, %v2039_v2 }
 0x7b7   : > { %v1361_v51 = vpop.f32.mrf.mxu0 }
 0x7b8   : > { %1365 = vst.msk [vmem:[%s471_s15] sm:$0xff] %vm507_vm1, %v1364_v50 }
 0x7b9   : > { %v1633_v52 = vpop.f32.mrf.mxu0 }
 0x7ba   : > { %1734 = shalt.err (!%p1731_p3)
}
 0x7bb   : > { %s1735_s15 = scalar_lea.hbm %s2102_s26, 128  ;;  %s1739_s25 = scalar_lea.hbm %s2158_s14, 256 }
 0x7bc   : > { %p1736_p4 = scmp.ne.s32.totalorder %s2102_s26, %s1735_s15  ;;  %p1740_p9 = scmp.lt.s32.totalorder %s2102_s26, %s2158_s14 }
 0x7bd   : > { %p1741_p10 = scmp.lt.s32.totalorder %s1739_s25, %s1735_s15 }
 0x7be   : > { %p1737_p7 = pnand %p1736_p4, %p1909_p5 }
 0x7bf   : > { %p1742_p11 = por %p1741_p10, %p1740_p9 }
 0x7c0   : > { %p1738_p8 = pneg %p1737_p7 }
 0x7c2   : > { %p1743_p12 = pnand %p1742_p11, %p1738_p8 }
 0x7c4   : > { %1746 = shalt.err (!%p1743_p12)
}
 0x7c5   : > { %1634 = dma.vmem_to_hbm [thread:$0]  (%p1909_p5), %s2104_s22, 128, %s2102_s26, %s1367_s17  }
 0x7c6 PF: > { %p1640_p13 = scmp.ge.s32.totalorder %s1781_s16, 2  ;;  %s1392_s28 = sand.u32 1, %s1769_s29  }
 0x7c7   : > { %s1393_s0 = scalar_lea.sflag [#allocation3], %s1392_s28 }
 0x7c8   : > { %p1637_p0 = pnand %p1640_p13, %p1913_p6 }
 0x7ca   : > { %p1638_p1 = pneg %p1637_p0 }
 0x7cc   : > { %1764 = dma.done.wait (%p1638_p1), %s1393_s0, 128  }
 0x7cd   : > { %1766 = vsyncadd (%p1638_p1), %s1393_s0, 4294967168  ;;  %s2168_s21 = sld [smem:[#allocation5_spill]]  ;;  %p24_p2 = scmp.ge.s32.totalorder %s1896_s19, 4  }
 0x7ce   : > { %s2169_s15 = sld [smem:[#allocation6_spill]]  ;;  %s2170_s29 = smov %s1773_s30 }
 0x7cf   : > { %s2172_s16 = smov %s1896_s19  ;;  %26 = sbr.rel (!%p24_p2) target bundleno = 6 (0x6), region = 114 }
 0x7d3   : > { %s2171_s30 = smov %s2168_s21 }
 0x7d4   :  { %1398 = vsyncpa [#allocation3], 1 }
 0x7d5   :  { %1400 = vsyncpa [#allocation3 + $0x1], 1 }

</bundles_post_ra>
